<compile_context>
chip_gen: v5e
topology: v5e:2x2
jax: 0.10.0
libtpu: 0.0.40
codegen_flags: <defaults>
</compile_context>

<pallas_src>
import jax
import jax.numpy as jnp
from jax.experimental import pallas as pl
from jax.experimental.pallas import tpu as pltpu


# ----------------------------------------------------------------------------
# Kernel 1: fused (nearest-2x upsample + ReflectionPad(1) + 3x3 conv) expressed
#           as per-row-parity matmuls (K = 3*Cin, N = 2*Cout) on the edge-padded
#           original image, storing a phase-interleaved tile and per-tile
#           BatchNorm partial sums.  One (batch, row-tile) per grid step.
# ----------------------------------------------------------------------------
def upconv_kernel(xcat_ref, w_ref, y_ref, stats_ref):
    # xcat_ref:  (1, H+2, W, 3*Cin)   edge-padded input with the 3 column-shifted
    #                                 windows pre-packed along channels (b, ci);
    #                                 resident across the row-tile axis.
    # w_ref:     (2, 2, 3*Cin, 2*Cout) folded weights [py, a, (b,ci), (px,co)].
    # y_ref:     (1, thh, 2, W, 2*Cout) conv tile, interleaved [m', py, n', (px,co)].
    # stats_ref: (1, 1, 2, 2*Cout)     per-tile [sum, sum_sq] per packed column.
    thh = y_ref.shape[1]
    w_img = y_ref.shape[3]
    n2 = y_ref.shape[4]               # 2*Cout  (px packed with cout)
    kdim = xcat_ref.shape[3]          # 3*Cin   (column offset packed with cin)
    m = thh * w_img

    row0 = pl.multiple_of(pl.program_id(1) * thh, thh)

    # Three row-offset windows (r = py + a in {0,1,2}); the middle one is shared
    # by both output-row parities.  Leading-axis slices + layout-preserving
    # reshapes only — no lane/sublane relayouts inside the kernel.
    win = [
        xcat_ref[0, pl.ds(row0 + r, thh), :, :].reshape(m, kdim)
        for r in range(3)
    ]

    s1 = jnp.zeros((1, n2), jnp.float32)
    s2 = jnp.zeros((1, n2), jnp.float32)
    for py in range(2):
        # Two fused MXU matmuls per output-row parity (K = 3*Cin, N = 2*Cout).
        acc = jnp.dot(win[py], w_ref[py, 0],
                      preferred_element_type=jnp.float32)
        acc = acc + jnp.dot(win[py + 1], w_ref[py, 1],
                            preferred_element_type=jnp.float32)
        # Interleaved store: axis 2 is the output-row parity, the packed lane
        # axis (px, cout) interleaves output columns for free later.
        y_ref[0, :, py] = acc.reshape(thh, w_img, n2)
        s1 = s1 + jnp.sum(acc, axis=0, keepdims=True)
        s2 = s2 + jnp.sum(acc * acc, axis=0, keepdims=True)

    stats_ref[0, 0, 0:1, :] = s1
    stats_ref[0, 0, 1:2, :] = s2


# ----------------------------------------------------------------------------
# Kernel 2: fused BatchNorm normalize (precomputed per-channel scale/shift)
#           + LeakyReLU(0.01), in-place on the same interleaved tiles.
# ----------------------------------------------------------------------------
def bn_lrelu_kernel(y_ref, scale_ref, shift_ref, o_ref):
    # y_ref/o_ref: (1, thh, 2, W, 2*Cout);  scale/shift: (1, 2*Cout), packed (px, co).
    z = y_ref[...] * scale_ref[...] + shift_ref[...]
    o_ref[...] = jnp.where(z > 0, z, 0.01 * z)


# ----------------------------------------------------------------------------
# Plain-JAX glue (tiny tensors only).
# ----------------------------------------------------------------------------
def _l2_normalize(v, eps=1e-12):
    return v / jnp.maximum(jnp.linalg.norm(v), eps)


def spectral_normalize(weight_oihw, u):
    """One power iteration, matching torch.nn.utils.spectral_norm defaults.
    Returns (normalized_weight, updated_u)."""
    cout = weight_oihw.shape[0]
    wm = weight_oihw.reshape(cout, -1)                 # (Cout, Cin*3*3)
    v = _l2_normalize(wm.T @ u)
    u = _l2_normalize(wm @ v)
    sigma = u @ (wm @ v)
    return weight_oihw / sigma, u


def _fold_phase_weights_packed(w_hwio):
    """Fold the 3x3 kernel over (2x nearest upsample + ReflectionPad(1)) into
    matmul weights acting on the edge-padded original image.

    Returns (2, 2, 3*Cin, 2*Cout) indexed [py, a(row offset), b*Cin+ci, px*Cout+co],
    where b in {0,1,2} is the absolute column offset and px the column parity
    (zero-padded where a phase does not use a column offset)."""
    cin, cout = w_hwio.shape[2], w_hwio.shape[3]
    # R[parity, a, k] = 1 iff original tap k folds onto relative offset a.
    R = jnp.array([[[1., 0., 0.],
                    [0., 1., 1.]],
                   [[1., 1., 0.],
                    [0., 0., 1.]]], jnp.float32)                   # (2, 2, 3)
    # weff[py, px, a, b', ci, co]
    weff = jnp.einsum('pak,qbl,klio->pqabio', R, R, w_hwio,
                      precision=jax.lax.Precision.HIGHEST)
    wp = jnp.zeros((2, 2, 3, cin, 2, cout), jnp.float32)   # [py, a, b, ci, px, co]
    for px in range(2):
        for bp in range(2):
            wp = wp.at[:, :, px + bp, :, px, :].set(weff[:, px, :, bp, :, :])
    return wp.reshape(2, 2, 3 * cin, 2 * cout)


def _vmem_limit_bytes():
    """Per-generation VMEM limit: ~100 MiB on 128 MiB chips (v5e/v6e), stays
    under 64 MiB on v7x; conservative fallback if the query is unavailable."""
    phys = 64 * 1024 * 1024
    try:
        phys = int(pltpu.get_tpu_info().vmem_capacity_bytes)
    except Exception:
        pass
    return max(32 * 1024 * 1024, min(phys - 16 * 1024 * 1024, 100 * 1024 * 1024))


def _choose_row_tile(N, H, W, Cin, Cout, budget_bytes):
    """Largest original-resolution row tile (divisor of H) whose double-buffered
    blocks + in-kernel temporaries fit the budget; then shrunk only as needed to
    give v7x's two TensorCores >= 4 balanced grid steps."""
    cands = sorted({d for d in range(1, H + 1) if H % d == 0}, reverse=True)

    def step_bytes(thh):
        xcat_blk = (H + 2) * W * 3 * Cin * 4
        w_blk = 2 * 2 * 3 * Cin * 2 * Cout * 4
        y_blk = thh * 2 * W * 2 * Cout * 4
        st_blk = 2 * 2 * Cout * 4
        temps = 3 * thh * W * 3 * Cin * 4 + 2 * thh * W * 2 * Cout * 4
        return 2 * (xcat_blk + w_blk + y_blk + st_blk) + temps

    thh = next((c for c in cands if step_bytes(c) <= budget_bytes), cands[-1])
    while N * (H // thh) < 4 and thh % 2 == 0 and H % (thh // 2) == 0:
        thh //= 2
    return max(thh, 1)


# ----------------------------------------------------------------------------
# Functional forward (jit-safe; returns the advanced power-iteration vector).
# ----------------------------------------------------------------------------
def upconv_forward(weight, u, gamma, beta, eps, x_nchw):
    N, Cin, H, W = x_nchw.shape
    Cout = weight.shape[0]
    Ho, Wo = 2 * H, 2 * W

    vmem_limit = _vmem_limit_bytes()
    thh = _choose_row_tile(N, H, W, Cin, Cout, budget_bytes=vmem_limit // 2)
    nT = H // thh

    # ---- spectral-norm reparametrization (+ persistent power iteration).
    w_sn, u_new = spectral_normalize(weight, u)
    w_hwio = jnp.transpose(w_sn, (2, 3, 1, 0))             # (3, 3, Cin, Cout)
    w_packed = _fold_phase_weights_packed(w_hwio)          # (2, 2, 3*Cin, 2*Cout)

    # ---- input layout plumbing on the SMALL input (one fused XLA pass):
    # edge-pad (upsample + reflection-pad collapse to this), go channels-last,
    # and pre-pack the 3 column-shifted windows along channels so the kernel
    # contraction dim is K = 3*Cin with no in-kernel lane relayouts.
    xe = jnp.pad(x_nchw, ((0, 0), (0, 0), (1, 1), (1, 1)), mode="edge")
    xe = jnp.transpose(xe, (0, 2, 3, 1))                   # (N, H+2, W+2, Cin)
    xcat = jnp.concatenate(
        [xe[:, :, 0:W, :], xe[:, :, 1:W + 1, :], xe[:, :, 2:W + 2, :]],
        axis=-1)                                           # (N, H+2, W, 3*Cin)

    # ---- Pallas: fused upsample + pad + conv (+ BN partial sums) ------------
    conv6, stats = pl.pallas_call(
        upconv_kernel,
        out_shape=(
            jax.ShapeDtypeStruct((N, H, 2, W, 2 * Cout), jnp.float32),
            jax.ShapeDtypeStruct((N, nT, 2, 2 * Cout), jnp.float32),
        ),
        grid=(N, nT),
        in_specs=[
            # Whole packed image per batch element; constant over the row-tile
            # axis so it stays resident (no re-DMA).
            pl.BlockSpec((1, H + 2, W, 3 * Cin), lambda n, t: (n, 0, 0, 0)),
            pl.BlockSpec((2, 2, 3 * Cin, 2 * Cout), lambda n, t: (0, 0, 0, 0)),
        ],
        out_specs=(
            pl.BlockSpec((1, thh, 2, W, 2 * Cout), lambda n, t: (n, t, 0, 0, 0)),
            pl.BlockSpec((1, 1, 2, 2 * Cout), lambda n, t: (n, t, 0, 0)),
        ),
        compiler_params=pltpu.CompilerParams(
            dimension_semantics=("parallel", "parallel"),
            vmem_limit_bytes=vmem_limit,
        ),
    )(xcat, w_packed)

    # ---- BN batch statistics from the tiny per-tile partial sums ------------
    cnt = float(N * Ho * Wo)
    s1 = jnp.sum(stats[:, :, 0, :], axis=(0, 1)).reshape(2, Cout).sum(axis=0)
    s2 = jnp.sum(stats[:, :, 1, :], axis=(0, 1)).reshape(2, Cout).sum(axis=0)
    mean = s1 / cnt
    var = jnp.maximum(s2 / cnt - mean * mean, 0.0)         # biased variance
    inv_std = jax.lax.rsqrt(var + eps)
    scale = gamma * inv_std
    shift = beta - mean * scale
    scale_p = jnp.tile(scale, 2).reshape(1, 2 * Cout)      # packed (px, co)
    shift_p = jnp.tile(shift, 2).reshape(1, 2 * Cout)

    # ---- Pallas: fused BN normalize + LeakyReLU, in place --------------------
    out6 = pl.pallas_call(
        bn_lrelu_kernel,
        out_shape=jax.ShapeDtypeStruct((N, H, 2, W, 2 * Cout), jnp.float32),
        grid=(N, nT),
        in_specs=[
            pl.BlockSpec((1, thh, 2, W, 2 * Cout), lambda n, t: (n, t, 0, 0, 0)),
            pl.BlockSpec((1, 2 * Cout), lambda n, t: (0, 0)),
            pl.BlockSpec((1, 2 * Cout), lambda n, t: (0, 0)),
        ],
        out_specs=pl.BlockSpec((1, thh, 2, W, 2 * Cout),
                               lambda n, t: (n, t, 0, 0, 0)),
        input_output_aliases={0: 0},
        compiler_params=pltpu.CompilerParams(
            dimension_semantics=("parallel", "parallel"),
            vmem_limit_bytes=vmem_limit,
        ),
    )(conv6, scale_p, shift_p)

    # ---- glue: de-phase is a FREE reshape; only NHWC -> NCHW remains --------
    out = jnp.transpose(out6.reshape(N, Ho, Wo, Cout), (0, 3, 1, 2))
    return out, u_new


class UpConvBlockPallas:
    """JAX/Pallas re-implementation of UpConvBlock.forward."""

    def __init__(self, in_channel, out_channel, key):
        self.cin = in_channel
        self.cout = out_channel
        k_w, k_b, k_u = jax.random.split(key, 3)
        fan_in = in_channel * 3 * 3
        bound = 1.0 / (fan_in ** 0.5)
        self.weight = jax.random.uniform(
            k_w, (out_channel, in_channel, 3, 3), jnp.float32, -bound, bound)
        # Parameter only: the conv bias cancels exactly under training-mode
        # BatchNorm, so it never enters the kernels.
        self.bias = jax.random.uniform(
            k_b, (out_channel,), jnp.float32, -bound, bound)
        self.u = _l2_normalize(
            jax.random.normal(k_u, (out_channel,), jnp.float32))
        # BatchNorm2d affine defaults: gamma=1, beta=0, eps=1e-5.
        self.gamma = jnp.ones((out_channel,), jnp.float32)
        self.beta = jnp.zeros((out_channel,), jnp.float32)
        self.eps = 1e-5
        self._forward = jax.jit(upconv_forward)

    def __call__(self, x_nchw):
        assert x_nchw.shape[1] == self.cin
        out, u_new = self._forward(self.weight, self.u, self.gamma, self.beta,
                                   self.eps, x_nchw)
        self.u = u_new   # concrete array returned from jit -> safe eager update
        return out


# ----------------------------------------------------------------------------
# Pure-JAX reference mirroring the PyTorch module (validation only).
# ----------------------------------------------------------------------------
def _reference_forward(weight_oihw, bias, u, gamma, beta, eps, x_nchw):
    y = jnp.repeat(jnp.repeat(x_nchw, 2, axis=2), 2, axis=3)           # nearest 2x
    y = jnp.pad(y, ((0, 0), (0, 0), (1, 1), (1, 1)), mode="reflect")   # ReflectionPad2d(1)
    w_sn, _ = spectral_normalize(weight_oihw, u)
    conv = jax.lax.conv_general_dilated(
        y, w_sn, window_strides=(1, 1), padding="VALID",
        dimension_numbers=("NCHW", "OIHW", "NCHW"),
        precision=jax.lax.Precision.HIGHEST)
    conv = conv + bias.reshape(1, -1, 1, 1)
    mean = jnp.mean(conv, axis=(0, 2, 3), keepdims=True)
    var = jnp.mean((conv - mean) ** 2, axis=(0, 2, 3), keepdims=True)
    z = (conv - mean) / jnp.sqrt(var + eps)
    z = z * gamma.reshape(1, -1, 1, 1) + beta.reshape(1, -1, 1, 1)
    return jnp.where(z > 0, z, 0.01 * z)


if __name__ == "__main__":
    key = jax.random.PRNGKey(0)
    k_param, k_x = jax.random.split(key)

    N, C_in, C_out, H, W = 2, 4, 8, 16, 16
    block = UpConvBlockPallas(C_in, C_out, k_param)
    x = jax.random.normal(k_x, (N, C_in, H, W), jnp.float32)

    u0 = block.u                      # snapshot: forward() advances the power iteration
    out = jax.block_until_ready(block(x))

    assert out.shape == (N, C_out, 2 * H, 2 * W), out.shape
    assert bool(jnp.all(jnp.isfinite(out)))

    ref = jax.block_until_ready(
        _reference_forward(block.weight, block.bias, u0,
                           block.gamma, block.beta, block.eps, x))
    # Tolerance covers default-precision in-kernel MXU passes vs the HIGHEST-
    # precision XLA reference conv.
    max_err = float(jnp.max(jnp.abs(out - ref)))
    assert max_err < 3e-3, f"mismatch vs pure-JAX reference: max_err={max_err}"
    print("KERNEL_OK")
</pallas_src>

<mosaic_0001>
module attributes {stable_mosaic.version = 11 : i64} {
  func.func @upconv_kernel(%arg0: i32, %arg1: i32, %arg2: memref<1x18x16x12xf32, #tpu.memory_space<vmem>>, %arg3: memref<2x2x12x16xf32, #tpu.memory_space<vmem>>, %arg4: memref<1x8x2x16x16xf32, #tpu.memory_space<vmem>>, %arg5: memref<1x1x2x16xf32, #tpu.memory_space<vmem>>) attributes {dimension_semantics = [#tpu.dimension_semantics<parallel>, #tpu.dimension_semantics<parallel>], iteration_bounds = array<i64: 2, 2>, scalar_prefetch = 0 : i64, scratch_operands = 0 : i64, tpu.core_type = #tpu.core_type<tc>, window_params = [{transform_indices = @transform_0, window_bounds = array<i64: 1, 18, 16, 12>}, {pipeline_mode = #tpu.pipeline_mode<synchronous>, transform_indices = @transform_1, window_bounds = array<i64: 2, 2, 12, 16>}, {transform_indices = @transform_2, window_bounds = array<i64: 1, 8, 2, 16, 16>}, {transform_indices = @transform_3, window_bounds = array<i64: 1, 1, 2, 16>}]} {
    %c8_i32 = arith.constant 8 : i32
    %0 = arith.muli %arg1, %c8_i32 : i32
    %1 = tpu.assume_multiple %0, 8 : i32
    %c0_i32 = arith.constant 0 : i32
    %2 = arith.addi %1, %c0_i32 : i32
    %c0 = arith.constant 0 : index
    %3 = arith.index_cast %2 : i32 to index
    %c0_0 = arith.constant 0 : index
    %c0_1 = arith.constant 0 : index
    %4 = vector.load %arg2[%c0, %3, %c0_0, %c0_1] : memref<1x18x16x12xf32, #tpu.memory_space<vmem>>, vector<1x8x16x12xf32>
    %5 = vector.shape_cast %4 : vector<1x8x16x12xf32> to vector<8x16x12xf32>
    %6 = vector.shape_cast %5 : vector<8x16x12xf32> to vector<128x12xf32>
    %c1_i32 = arith.constant 1 : i32
    %7 = arith.addi %1, %c1_i32 : i32
    %c0_2 = arith.constant 0 : index
    %8 = arith.index_cast %7 : i32 to index
    %c0_3 = arith.constant 0 : index
    %c0_4 = arith.constant 0 : index
    %9 = vector.load %arg2[%c0_2, %8, %c0_3, %c0_4] : memref<1x18x16x12xf32, #tpu.memory_space<vmem>>, vector<1x8x16x12xf32>
    %10 = vector.shape_cast %9 : vector<1x8x16x12xf32> to vector<8x16x12xf32>
    %11 = vector.shape_cast %10 : vector<8x16x12xf32> to vector<128x12xf32>
    %c2_i32 = arith.constant 2 : i32
    %12 = arith.addi %1, %c2_i32 : i32
    %c0_5 = arith.constant 0 : index
    %13 = arith.index_cast %12 : i32 to index
    %c0_6 = arith.constant 0 : index
    %c0_7 = arith.constant 0 : index
    %14 = vector.load %arg2[%c0_5, %13, %c0_6, %c0_7] : memref<1x18x16x12xf32, #tpu.memory_space<vmem>>, vector<1x8x16x12xf32>
    %15 = vector.shape_cast %14 : vector<1x8x16x12xf32> to vector<8x16x12xf32>
    %16 = vector.shape_cast %15 : vector<8x16x12xf32> to vector<128x12xf32>
    %cst = arith.constant 0.000000e+00 : f32
    %17 = vector.broadcast %cst : f32 to vector<1x16xf32>
    %cst_8 = arith.constant 0.000000e+00 : f32
    %18 = vector.broadcast %cst_8 : f32 to vector<1x16xf32>
    %c0_9 = arith.constant 0 : index
    %c0_10 = arith.constant 0 : index
    %c0_11 = arith.constant 0 : index
    %c0_12 = arith.constant 0 : index
    %19 = vector.load %arg3[%c0_9, %c0_10, %c0_11, %c0_12] : memref<2x2x12x16xf32, #tpu.memory_space<vmem>>, vector<1x1x12x16xf32>
    %20 = vector.shape_cast %19 : vector<1x1x12x16xf32> to vector<12x16xf32>
    %cst_13 = arith.constant dense<0.000000e+00> : vector<128x16xf32>
    %21 = tpu.matmul %6, %20, %cst_13 {dimension_numbers = #tpu.dot_dimension_numbers<[1], [0], [0], [1], [0, 0, 1, 1], [], []>} : vector<128x12xf32>, vector<12x16xf32>, vector<128x16xf32> -> vector<128x16xf32>
    %c0_14 = arith.constant 0 : index
    %c1 = arith.constant 1 : index
    %c0_15 = arith.constant 0 : index
    %c0_16 = arith.constant 0 : index
    %22 = vector.load %arg3[%c0_14, %c1, %c0_15, %c0_16] : memref<2x2x12x16xf32, #tpu.memory_space<vmem>>, vector<1x1x12x16xf32>
    %23 = vector.shape_cast %22 : vector<1x1x12x16xf32> to vector<12x16xf32>
    %cst_17 = arith.constant dense<0.000000e+00> : vector<128x16xf32>
    %24 = tpu.matmul %11, %23, %cst_17 {dimension_numbers = #tpu.dot_dimension_numbers<[1], [0], [0], [1], [0, 0, 1, 1], [], []>} : vector<128x12xf32>, vector<12x16xf32>, vector<128x16xf32> -> vector<128x16xf32>
    %25 = arith.addf %21, %24 : vector<128x16xf32>
    %26 = vector.shape_cast %25 : vector<128x16xf32> to vector<8x16x16xf32>
    %c0_18 = arith.constant 0 : index
    %c0_19 = arith.constant 0 : index
    %c0_20 = arith.constant 0 : index
    %c0_21 = arith.constant 0 : index
    %c0_22 = arith.constant 0 : index
    %27 = vector.load %arg4[%c0_18, %c0_19, %c0_20, %c0_21, %c0_22] : memref<1x8x2x16x16xf32, #tpu.memory_space<vmem>>, vector<1x8x1x16x16xf32>
    %28 = vector.shape_cast %27 : vector<1x8x1x16x16xf32> to vector<8x16x16xf32>
    %29 = vector.shape_cast %26 : vector<8x16x16xf32> to vector<1x8x1x16x16xf32>
    tpu.vector_store %arg4[%c0_18, %c0_19, %c0_20, %c0_21, %c0_22], %29 {strides = array<i32>} : memref<1x8x2x16x16xf32, #tpu.memory_space<vmem>>, vector<1x8x1x16x16xf32>,
    %cst_23 = arith.constant dense<0.000000e+00> : vector<16xf32>
    %30 = vector.multi_reduction <add>, %25, %cst_23 [0] : vector<128x16xf32> to vector<16xf32>
    %31 = vector.shape_cast %30 : vector<16xf32> to vector<1x16xf32>
    %32 = arith.addf %17, %31 : vector<1x16xf32>
    %33 = arith.mulf %25, %25 : vector<128x16xf32>
    %cst_24 = arith.constant dense<0.000000e+00> : vector<16xf32>
    %34 = vector.multi_reduction <add>, %33, %cst_24 [0] : vector<128x16xf32> to vector<16xf32>
    %35 = vector.shape_cast %34 : vector<16xf32> to vector<1x16xf32>
    %36 = arith.addf %18, %35 : vector<1x16xf32>
    %c1_25 = arith.constant 1 : index
    %c0_26 = arith.constant 0 : index
    %c0_27 = arith.constant 0 : index
    %c0_28 = arith.constant 0 : index
    %37 = vector.load %arg3[%c1_25, %c0_26, %c0_27, %c0_28] : memref<2x2x12x16xf32, #tpu.memory_space<vmem>>, vector<1x1x12x16xf32>
    %38 = vector.shape_cast %37 : vector<1x1x12x16xf32> to vector<12x16xf32>
    %cst_29 = arith.constant dense<0.000000e+00> : vector<128x16xf32>
    %39 = tpu.matmul %11, %38, %cst_29 {dimension_numbers = #tpu.dot_dimension_numbers<[1], [0], [0], [1], [0, 0, 1, 1], [], []>} : vector<128x12xf32>, vector<12x16xf32>, vector<128x16xf32> -> vector<128x16xf32>
    %c1_30 = arith.constant 1 : index
    %c1_31 = arith.constant 1 : index
    %c0_32 = arith.constant 0 : index
    %c0_33 = arith.constant 0 : index
    %40 = vector.load %arg3[%c1_30, %c1_31, %c0_32, %c0_33] : memref<2x2x12x16xf32, #tpu.memory_space<vmem>>, vector<1x1x12x16xf32>
    %41 = vector.shape_cast %40 : vector<1x1x12x16xf32> to vector<12x16xf32>
    %cst_34 = arith.constant dense<0.000000e+00> : vector<128x16xf32>
    %42 = tpu.matmul %16, %41, %cst_34 {dimension_numbers = #tpu.dot_dimension_numbers<[1], [0], [0], [1], [0, 0, 1, 1], [], []>} : vector<128x12xf32>, vector<12x16xf32>, vector<128x16xf32> -> vector<128x16xf32>
    %43 = arith.addf %39, %42 : vector<128x16xf32>
    %44 = vector.shape_cast %43 : vector<128x16xf32> to vector<8x16x16xf32>
    %c0_35 = arith.constant 0 : index
    %c0_36 = arith.constant 0 : index
    %c1_37 = arith.constant 1 : index
    %c0_38 = arith.constant 0 : index
    %c0_39 = arith.constant 0 : index
    %45 = vector.load %arg4[%c0_35, %c0_36, %c1_37, %c0_38, %c0_39] : memref<1x8x2x16x16xf32, #tpu.memory_space<vmem>>, vector<1x8x1x16x16xf32>
    %46 = vector.shape_cast %45 : vector<1x8x1x16x16xf32> to vector<8x16x16xf32>
    %47 = vector.shape_cast %44 : vector<8x16x16xf32> to vector<1x8x1x16x16xf32>
    tpu.vector_store %arg4[%c0_35, %c0_36, %c1_37, %c0_38, %c0_39], %47 {strides = array<i32>} : memref<1x8x2x16x16xf32, #tpu.memory_space<vmem>>, vector<1x8x1x16x16xf32>,
    %cst_40 = arith.constant dense<0.000000e+00> : vector<16xf32>
    %48 = vector.multi_reduction <add>, %43, %cst_40 [0] : vector<128x16xf32> to vector<16xf32>
    %49 = vector.shape_cast %48 : vector<16xf32> to vector<1x16xf32>
    %50 = arith.addf %32, %49 : vector<1x16xf32>
    %51 = arith.mulf %43, %43 : vector<128x16xf32>
    %cst_41 = arith.constant dense<0.000000e+00> : vector<16xf32>
    %52 = vector.multi_reduction <add>, %51, %cst_41 [0] : vector<128x16xf32> to vector<16xf32>
    %53 = vector.shape_cast %52 : vector<16xf32> to vector<1x16xf32>
    %54 = arith.addf %36, %53 : vector<1x16xf32>
    %c0_42 = arith.constant 0 : index
    %c0_43 = arith.constant 0 : index
    %c0_44 = arith.constant 0 : index
    %c0_45 = arith.constant 0 : index
    %55 = vector.load %arg5[%c0_42, %c0_43, %c0_44, %c0_45] : memref<1x1x2x16xf32, #tpu.memory_space<vmem>>, vector<1x1x1x16xf32>
    %56 = vector.shape_cast %55 : vector<1x1x1x16xf32> to vector<1x16xf32>
    %57 = vector.shape_cast %50 : vector<1x16xf32> to vector<1x1x1x16xf32>
    tpu.vector_store %arg5[%c0_42, %c0_43, %c0_44, %c0_45], %57 {strides = array<i32>} : memref<1x1x2x16xf32, #tpu.memory_space<vmem>>, vector<1x1x1x16xf32>,
    %c0_46 = arith.constant 0 : index
    %c0_47 = arith.constant 0 : index
    %c1_48 = arith.constant 1 : index
    %c0_49 = arith.constant 0 : index
    %58 = vector.load %arg5[%c0_46, %c0_47, %c1_48, %c0_49] : memref<1x1x2x16xf32, #tpu.memory_space<vmem>>, vector<1x1x1x16xf32>
    %59 = vector.shape_cast %58 : vector<1x1x1x16xf32> to vector<1x16xf32>
    %60 = vector.shape_cast %54 : vector<1x16xf32> to vector<1x1x1x16xf32>
    tpu.vector_store %arg5[%c0_46, %c0_47, %c1_48, %c0_49], %60 {strides = array<i32>} : memref<1x1x2x16xf32, #tpu.memory_space<vmem>>, vector<1x1x1x16xf32>,
    return
  }
  func.func @transform_0(%arg0: i32, %arg1: i32) -> (i32, i32, i32, i32) {
    %c0_i32 = arith.constant 0 : i32
    %c0_i32_0 = arith.constant 0 : i32
    %c0_i32_1 = arith.constant 0 : i32
    %c0_i32_2 = arith.constant 0 : i32
    return %arg0, %c0_i32, %c0_i32_0, %c0_i32_1 : i32, i32, i32, i32
  }
  func.func @transform_1(%arg0: i32, %arg1: i32) -> (i32, i32, i32, i32) {
    %c0_i32 = arith.constant 0 : i32
    %c0_i32_0 = arith.constant 0 : i32
    %c0_i32_1 = arith.constant 0 : i32
    %c0_i32_2 = arith.constant 0 : i32
    %c0_i32_3 = arith.constant 0 : i32
    return %c0_i32, %c0_i32_0, %c0_i32_1, %c0_i32_2 : i32, i32, i32, i32
  }
  func.func @transform_2(%arg0: i32, %arg1: i32) -> (i32, i32, i32, i32, i32) {
    %c0_i32 = arith.constant 0 : i32
    %c0_i32_0 = arith.constant 0 : i32
    %c0_i32_1 = arith.constant 0 : i32
    %c0_i32_2 = arith.constant 0 : i32
    return %arg0, %arg1, %c0_i32, %c0_i32_0, %c0_i32_1 : i32, i32, i32, i32, i32
  }
  func.func @transform_3(%arg0: i32, %arg1: i32) -> (i32, i32, i32, i32) {
    %c0_i32 = arith.constant 0 : i32
    %c0_i32_0 = arith.constant 0 : i32
    %c0_i32_1 = arith.constant 0 : i32
    return %arg0, %arg1, %c0_i32, %c0_i32_0 : i32, i32, i32, i32
  }
}

module attributes {stable_mosaic.version = 11 : i64} {
  func.func @bn_lrelu_kernel(%arg0: i32, %arg1: i32, %arg2: memref<1x8x2x16x16xf32, #tpu.memory_space<vmem>>, %arg3: memref<1x16xf32, #tpu.memory_space<vmem>>, %arg4: memref<1x16xf32, #tpu.memory_space<vmem>>, %arg5: memref<1x8x2x16x16xf32, #tpu.memory_space<vmem>>) attributes {dimension_semantics = [#tpu.dimension_semantics<parallel>, #tpu.dimension_semantics<parallel>], iteration_bounds = array<i64: 2, 2>, scalar_prefetch = 0 : i64, scratch_operands = 0 : i64, tpu.core_type = #tpu.core_type<tc>, window_params = [{transform_indices = @transform_0, window_bounds = array<i64: 1, 8, 2, 16, 16>}, {pipeline_mode = #tpu.pipeline_mode<synchronous>, transform_indices = @transform_1, window_bounds = array<i64: 1, 16>}, {pipeline_mode = #tpu.pipeline_mode<synchronous>, transform_indices = @transform_2, window_bounds = array<i64: 1, 16>}, {transform_indices = @transform_3, window_bounds = array<i64: 1, 8, 2, 16, 16>}]} {
    %c0 = arith.constant 0 : index
    %c0_0 = arith.constant 0 : index
    %c0_1 = arith.constant 0 : index
    %c0_2 = arith.constant 0 : index
    %c0_3 = arith.constant 0 : index
    %0 = vector.load %arg2[%c0, %c0_0, %c0_1, %c0_2, %c0_3] : memref<1x8x2x16x16xf32, #tpu.memory_space<vmem>>, vector<1x8x2x16x16xf32>
    %c0_4 = arith.constant 0 : index
    %c0_5 = arith.constant 0 : index
    %1 = vector.load %arg3[%c0_4, %c0_5] : memref<1x16xf32, #tpu.memory_space<vmem>>, vector<1x16xf32>
    %2 = vector.shape_cast %1 : vector<1x16xf32> to vector<1x1x1x1x16xf32>
    %3 = vector.broadcast %2 : vector<1x1x1x1x16xf32> to vector<1x8x2x16x16xf32>
    %4 = arith.mulf %0, %3 : vector<1x8x2x16x16xf32>
    %c0_6 = arith.constant 0 : index
    %c0_7 = arith.constant 0 : index
    %5 = vector.load %arg4[%c0_6, %c0_7] : memref<1x16xf32, #tpu.memory_space<vmem>>, vector<1x16xf32>
    %6 = vector.shape_cast %5 : vector<1x16xf32> to vector<1x1x1x1x16xf32>
    %7 = vector.broadcast %6 : vector<1x1x1x1x16xf32> to vector<1x8x2x16x16xf32>
    %8 = arith.addf %4, %7 : vector<1x8x2x16x16xf32>
    %cst = arith.constant 0.000000e+00 : f32
    %9 = vector.broadcast %cst : f32 to vector<1x8x2x16x16xf32>
    %10 = arith.cmpf ogt, %8, %9 : vector<1x8x2x16x16xf32>
    %cst_8 = arith.constant 0.00999999977 : f32
    %11 = vector.broadcast %cst_8 : f32 to vector<1x8x2x16x16xf32>
    %12 = arith.mulf %11, %8 : vector<1x8x2x16x16xf32>
    %13 = arith.select %10, %8, %12 : vector<1x8x2x16x16xi1>, vector<1x8x2x16x16xf32>
    %c0_9 = arith.constant 0 : index
    %c0_10 = arith.constant 0 : index
    %c0_11 = arith.constant 0 : index
    %c0_12 = arith.constant 0 : index
    %c0_13 = arith.constant 0 : index
    %14 = vector.load %arg5[%c0_9, %c0_10, %c0_11, %c0_12, %c0_13] : memref<1x8x2x16x16xf32, #tpu.memory_space<vmem>>, vector<1x8x2x16x16xf32>
    tpu.vector_store %arg5[%c0_9, %c0_10, %c0_11, %c0_12, %c0_13], %13 {strides = array<i32>} : memref<1x8x2x16x16xf32, #tpu.memory_space<vmem>>, vector<1x8x2x16x16xf32>,
    return
  }
  func.func @transform_0(%arg0: i32, %arg1: i32) -> (i32, i32, i32, i32, i32) {
    %c0_i32 = arith.constant 0 : i32
    %c0_i32_0 = arith.constant 0 : i32
    %c0_i32_1 = arith.constant 0 : i32
    %c0_i32_2 = arith.constant 0 : i32
    return %arg0, %arg1, %c0_i32, %c0_i32_0, %c0_i32_1 : i32, i32, i32, i32, i32
  }
  func.func @transform_1(%arg0: i32, %arg1: i32) -> (i32, i32) {
    %c0_i32 = arith.constant 0 : i32
    %c0_i32_0 = arith.constant 0 : i32
    %c0_i32_1 = arith.constant 0 : i32
    return %c0_i32, %c0_i32_0 : i32, i32
  }
  func.func @transform_2(%arg0: i32, %arg1: i32) -> (i32, i32) {
    %c0_i32 = arith.constant 0 : i32
    %c0_i32_0 = arith.constant 0 : i32
    %c0_i32_1 = arith.constant 0 : i32
    return %c0_i32, %c0_i32_0 : i32, i32
  }
  func.func @transform_3(%arg0: i32, %arg1: i32) -> (i32, i32, i32, i32, i32) {
    %c0_i32 = arith.constant 0 : i32
    %c0_i32_0 = arith.constant 0 : i32
    %c0_i32_1 = arith.constant 0 : i32
    %c0_i32_2 = arith.constant 0 : i32
    return %arg0, %arg1, %c0_i32, %c0_i32_0, %c0_i32_1 : i32, i32, i32, i32, i32
  }
}

</mosaic_0001>

<bundles_post_ra>
// kernel: tile.18
= control target key start
LH: loop header
LB: loop body
LE: loop exit
PB: predicated region body
PF: predicated region fallthrough
CT: control target
= control target key end

     0   :  { %s22_s0 = inlined_call_operand.vmem [shape: f32[8], index: 0, kind: input, shape index: {}]   ;;  %s23_s1 = inlined_call_operand.vmem [shape: f32[2,8], index: 1, kind: output, shape index: {}]  }
   0x1   :  { %v4_v0 = vld [vmem:[%s22_s0] ss:$0 sm:$0xff] }
   0x2   :  { %5 = vst [vmem:[%s23_s1] sm:$0x3] %v4_v0 }

// kernel: tile.19
= control target key start
LH: loop header
LB: loop body
LE: loop exit
PB: predicated region body
PF: predicated region fallthrough
CT: control target
= control target key end

     0   :  { %vm7_vm0 = vcmask 64512   ;;  %vm13_vm1 = vcmask 130112   ;;  %s39_s0 = inlined_call_operand.vmem [shape: f32[2,8], index: 0, kind: input, shape index: {}]   ;;  %s40_s1 = inlined_call_operand.vmem [shape: f32[1,16], index: 1, kind: output, shape index: {}]  }
   0x1   :  { %v4_v0 = vld [vmem:[%s39_s0] sm:$0x3]  ;;  %s22_s0 = smov 8  }
   0x2   :  { %5 = vst [vmem:[#allocation1] sm:$0x3] %v4_v0 }
   0x9   :  { %v10_v1 = vld [vmem:[#allocation1 + $0x1] sm:$0x1]   ;;  %v6_v2 = vld [vmem:[#allocation1] sm:$0x1]  }
   0xa   :  { %11 = vrot.lane.b32.xlu0 %v10_v1, %s22_s0  ;;  %8 = vst.msk [vmem:[#allocation0] sm:$0x1] %vm7_vm0, %v6_v2  }
  0x7c   :  { %v12_v3 = vpop.permute.xlu0 %11  }
  0x7d   :  { %14 = vst.msk [vmem:[#allocation0] sm:$0x1] %vm13_vm1, %v12_v3  }
  0x84   :  { %v17_v4 = vld [vmem:[#allocation0] sm:$0x1] }
  0x85   :  { %20 = vst [vmem:[%s40_s1] sm:$0x1] %v17_v4 }

// kernel: upconv_forward.3
= control target key start
LH: loop header
LB: loop body
LE: loop exit
PB: predicated region body
PF: predicated region fallthrough
CT: control target
= control target key end

     0   :  { %s664_s12 = smov 0   ;;  %s666_s13 = smov 0   ;;  %s940_s0 = inlined_call_operand.vmem [shape: f32[2,16,2,16,16], index: 0, kind: input, shape index: {}, may-alias: {0,3}]   ;;  %s941_s1 = inlined_call_operand.vmem [shape: f32[1,16], index: 1, kind: input, shape index: {}]   ;;  %s942_s2 = inlined_call_operand.vmem [shape: f32[1,16], index: 2, kind: input, shape index: {}]   ;;  %s943_s3 = inlined_call_operand.vmem [shape: f32[2,16,2,16,16], index: 3, kind: output, shape index: {}, may-alias: {0,3}]  }
   0x1   :  { %s668_s14 = smov 0   ;;  %s670_s15 = smov 0  }
   0x2   :  { %s672_s16 = smov 0  }
   0x3 LB: > { %s22_s17 = sadd.s32 1, %s634_s14  ;;  %s25_s18 = sadd.s32 1, %s638_s15  ;;  %s642_s16 = sphi %s672_s16, %s13_s16   ;;  %s638_s15 = sphi %s670_s15, %s947_s15   ;;  %s634_s14 = sphi %s668_s14, %s946_s14   ;;  %s630_s13 = sphi %s666_s13, %s945_s13   ;;  %s626_s12 = sphi %s664_s12, %s944_s12  }
   0x4   : > { %p23_p0 = scmp.ge.s32.totalorder %s22_s17, 2  ;;  %p551_p1 = scmp.ge.s32.totalorder %s642_s16, 1 }
   0x5   : > { %p159_p2 = scmp.lt.s32.totalorder %s642_s16, 5 }
   0x6   : > { %s949_s17 = smov (%p23_p0, %s22_s17), 0  ;;  %s951_s18 = smov (!%p23_p0, %s25_s18), %s638_s15 }
   0x7   : > { %p160_p3 = pnand %p551_p1, %p159_p2  ;;  %p27_p4 = scmp.ge.s32.totalorder %s951_s18, 2 }
   0x8   : > { %s552_s19 = sshll.u32 (!%p160_p3), %s626_s12, 3  ;;  %p194_p5 = scmp.lt.s32.totalorder (!%p160_p3), %s630_s13, 1 }
   0x9   : > { %s953_s18 = smov (%p27_p4, %s951_s18), 0  ;;  %163 = sbr.rel (%p160_p3) target bundleno = 65 (0x41), region = 32 }
   0xa   : > { %p196_p6 = scmp.lt.s32.totalorder (!%p160_p3), %s552_s19, 15 }
   0xe   : > { %s955_s13 = smov (!%p194_p5, %s630_s13), 1  ;;  %s957_s19 = smov (!%p196_p6, %s552_s19), 15  ;;  %v699_v0 = vld [vmem:[%s941_s1] ss:$0 sm:$0xff]  ;;  %vm415_vm0 = vcmask 130048  }
   0xf   : > { %s554_s20 = sshll.u32 %s955_s13, 6  ;;  %s553_s21 = sshll.u32 %s957_s19, 2  ;;  %v712_v1 = vld [vmem:[%s942_s2] ss:$0 sm:$0xff] }
  0x10   : > { %s694_s22 = sadd.s32 %s554_s20, %s553_s21 }
  0x11   : > { %s555_s25 = sshll.u32 %s694_s22, 3 }
  0x12   : > { %s707_s28 = scalar_lea.vmem %s940_s0, %s555_s25  ;;  %s749_s6 = scalar_lea.vmem %s943_s3, %s555_s25 }
  0x13   : > { %v215_v2 = vld [vmem:[%s707_s28] sm:$0xff]  ;;  %v216_v3 = vld [vmem:[%s707_s28 + $0x8] sm:$0xff]  ;;  %v217_v4 = vld [vmem:[%s707_s28 + $0x10] sm:$0xff] }
  0x14   : > { %v218_v5 = vld [vmem:[%s707_s28 + $0x18] sm:$0xff]  ;;  %v219_v6 = vld [vmem:[%s707_s28 + $0x20] sm:$0xff]  ;;  %v220_v7 = vld [vmem:[%s707_s28 + $0x28] sm:$0xff]  ;;  %v251_v8 = vmul.f32 %v699_v0, %v215_v2  ;;  %v252_v9 = vmul.f32 %v699_v0, %v216_v3  ;;  %v253_v10 = vmul.f32 %v699_v0, %v217_v4 }
  0x15   : > { %v221_v11 = vld [vmem:[%s707_s28 + $0x30] sm:$0xff]  ;;  %v222_v12 = vld [vmem:[%s707_s28 + $0x38] sm:$0xff]  ;;  %v223_v13 = vld [vmem:[%s707_s28 + $0x40] sm:$0xff]  ;;  %v254_v14 = vmul.f32 %v699_v0, %v218_v5  ;;  %v255_v15 = vmul.f32 %v699_v0, %v219_v6  ;;  %v256_v16 = vmul.f32 %v699_v0, %v220_v7 }
  0x16   : > { %v224_v17 = vld [vmem:[%s707_s28 + $0x48] sm:$0xff]  ;;  %v287_v18 = vadd.f32 %v712_v1, %v251_v8  ;;  %v288_v19 = vadd.f32 %v712_v1, %v252_v9  ;;  %v289_v20 = vadd.f32 %v712_v1, %v253_v10  ;;  %v257_v21 = vmul.f32 %v699_v0, %v221_v11  ;;  %v225_v29 = vld [vmem:[%s707_s28 + $0x50] sm:$0xff]  ;;  %v226_v36 = vld [vmem:[%s707_s28 + $0x58] sm:$0xff] }
  0x17   : > { %v290_v22 = vadd.f32 %v712_v1, %v254_v14  ;;  %v291_v23 = vadd.f32 %v712_v1, %v255_v15  ;;  %v292_v24 = vadd.f32 %v712_v1, %v256_v16  ;;  %v258_v25 = vmul.f32 %v699_v0, %v222_v12  ;;  %v227_v37 = vld [vmem:[%s707_s28 + $0x60] sm:$0xff]  ;;  %v228_v38 = vld [vmem:[%s707_s28 + $0x68] sm:$0xff]  ;;  %v229_v39 = vld [vmem:[%s707_s28 + $0x70] sm:$0xff] }
  0x18   : > { %vm319_vm1 = vcmp.gt.f32.partialorder %v287_v18, 0.0  ;;  %v351_v26 = vmul.f32 0.01, %v287_v18  ;;  %v293_v27 = vadd.f32 %v712_v1, %v257_v21  ;;  %v259_v28 = vmul.f32 %v699_v0, %v223_v13  ;;  %v230_v40 = vld [vmem:[%s707_s28 + $0x78] sm:$0xff]  ;;  %v231_v41 = vld [vmem:[%s707_s28 + $0x80] sm:$0xff]  ;;  %v232_v42 = vld [vmem:[%s707_s28 + $0x88] sm:$0xff] }
  0x19   : > { %vm320_vm2 = vcmp.gt.f32.partialorder %v288_v19, 0.0  ;;  %v352_v30 = vmul.f32 0.01, %v288_v19  ;;  %v294_v31 = vadd.f32 %v712_v1, %v258_v25  ;;  %v260_v32 = vmul.f32 %v699_v0, %v224_v17  ;;  %v759_v43 = vld [vmem:[%s707_s28 + $0x90] sm:$0xff]  ;;  %v762_v44 = vld [vmem:[%s707_s28 + $0x98] sm:$0xff]  ;;  %v765_v45 = vld [vmem:[%s707_s28 + $0xa0] sm:$0xff] }
  0x1a   : > { %v383_v33 = vsel %vm319_vm1, %v287_v18, %v351_v26  ;;  %vm321_vm3 = vcmp.gt.f32.partialorder %v289_v20, 0.0  ;;  %v353_v34 = vmul.f32 0.01, %v289_v20  ;;  %v295_v35 = vadd.f32 %v712_v1, %v259_v28  ;;  %v768_v46 = vld [vmem:[%s707_s28 + $0xa8] sm:$0xff]  ;;  %v771_v47 = vld [vmem:[%s707_s28 + $0xb0] sm:$0xff]  ;;  %v774_v48 = vld [vmem:[%s707_s28 + $0xb8] sm:$0xff] }
  0x1b   : > { %v777_v49 = vld [vmem:[%s707_s28 + $0xc0] sm:$0xff]  ;;  %v780_v50 = vld [vmem:[%s707_s28 + $0xc8] sm:$0xff]  ;;  %v783_v51 = vld [vmem:[%s707_s28 + $0xd0] sm:$0xff]  ;;  %v384_v52 = vsel %vm320_vm2, %v288_v19, %v352_v30  ;;  %vm322_vm4 = vcmp.gt.f32.partialorder %v290_v22, 0.0  ;;  %v354_v53 = vmul.f32 0.01, %v290_v22  ;;  %v296_v54 = vadd.f32 %v712_v1, %v260_v32 }
  0x1c   : > { %v788_v55 = vld [vmem:[%s707_s28 + $0xd8] sm:$0xff]  ;;  %v791_v56 = vld [vmem:[%s707_s28 + $0xe0] sm:$0xff]  ;;  %v794_v57 = vld [vmem:[%s707_s28 + $0xe8] sm:$0xff]  ;;  %v385_v58 = vsel %vm321_vm3, %v289_v20, %v353_v34  ;;  %vm323_vm5 = vcmp.gt.f32.partialorder %v291_v23, 0.0  ;;  %v355_v59 = vmul.f32 0.01, %v291_v23  ;;  %v261_v60 = vmul.f32 %v699_v0, %v225_v29 }
  0x1d   : > { %v799_v61 = vld [vmem:[%s707_s28 + $0xf0] sm:$0xff]  ;;  %v802_v62 = vld [vmem:[%s707_s28 + $0xf8] sm:$0xff]  ;;  %v386_v63 = vsel %vm322_vm4, %v290_v22, %v354_v53  ;;  %vm324_vm6 = vcmp.gt.f32.partialorder %v292_v24, 0.0  ;;  %v356_v2 = vmul.f32 0.01, %v292_v24  ;;  %vm325_vm7 = vcmp.gt.f32.partialorder %v293_v27, 0.0 }
  0x1e   : > { %416 = vst.msk [vmem:[%s749_s6] sm:$0xff] %vm415_vm0, %v383_v33  ;;  %v387_v3 = vsel %vm323_vm5, %v291_v23, %v355_v59  ;;  %v357_v4 = vmul.f32 0.01, %v293_v27  ;;  %vm326_vm8 = vcmp.gt.f32.partialorder %v294_v31, 0.0  ;;  %v358_v5 = vmul.f32 0.01, %v294_v31 }
  0x1f   : > { %417 = vst.msk [vmem:[%s749_s6 + $0x8] sm:$0xff] %vm415_vm0, %v384_v52  ;;  %v388_v6 = vsel %vm324_vm6, %v292_v24, %v356_v2  ;;  %vm327_vm9 = vcmp.gt.f32.partialorder %v295_v35, 0.0  ;;  %v359_v7 = vmul.f32 0.01, %v295_v35  ;;  %vm328_vm10 = vcmp.gt.f32.partialorder %v296_v54, 0.0 }
  0x20   : > { %418 = vst.msk [vmem:[%s749_s6 + $0x10] sm:$0xff] %vm415_vm0, %v385_v58  ;;  %v389_v8 = vsel %vm325_vm7, %v293_v27, %v357_v4  ;;  %v390_v9 = vsel %vm326_vm8, %v294_v31, %v358_v5  ;;  %v360_v10 = vmul.f32 0.01, %v296_v54  ;;  %v297_v11 = vadd.f32 %v712_v1, %v261_v60 }
  0x21   : > { %419 = vst.msk [vmem:[%s749_s6 + $0x18] sm:$0xff] %vm415_vm0, %v386_v63  ;;  %v391_v12 = vsel %vm327_vm9, %v295_v35, %v359_v7  ;;  %v262_v13 = vmul.f32 %v699_v0, %v226_v36  ;;  %v263_v14 = vmul.f32 %v699_v0, %v227_v37  ;;  %v264_v15 = vmul.f32 %v699_v0, %v228_v38 }
  0x22   : > { %420 = vst.msk [vmem:[%s749_s6 + $0x20] sm:$0xff] %vm415_vm0, %v387_v3  ;;  %v392_v16 = vsel %vm328_vm10, %v296_v54, %v360_v10  ;;  %vm329_vm11 = vcmp.gt.f32.partialorder %v297_v11, 0.0  ;;  %v361_v17 = vmul.f32 0.01, %v297_v11  ;;  %v265_v18 = vmul.f32 %v699_v0, %v229_v39 }
  0x23   : > { %421 = vst.msk [vmem:[%s749_s6 + $0x28] sm:$0xff] %vm415_vm0, %v388_v6  ;;  %v298_v19 = vadd.f32 %v712_v1, %v262_v13  ;;  %v299_v20 = vadd.f32 %v712_v1, %v263_v14  ;;  %v300_v21 = vadd.f32 %v712_v1, %v264_v15  ;;  %v266_v22 = vmul.f32 %v699_v0, %v230_v40 }
  0x24   : > { %422 = vst.msk [vmem:[%s749_s6 + $0x30] sm:$0xff] %vm415_vm0, %v389_v8  ;;  %v393_v23 = vsel %vm329_vm11, %v297_v11, %v361_v17  ;;  %v301_v24 = vadd.f32 %v712_v1, %v265_v18  ;;  %v267_v25 = vmul.f32 %v699_v0, %v231_v41  ;;  %v268_v26 = vmul.f32 %v699_v0, %v232_v42 }
  0x25   : > { %423 = vst.msk [vmem:[%s749_s6 + $0x38] sm:$0xff] %vm415_vm0, %v390_v9  ;;  %vm330_vm12 = vcmp.gt.f32.partialorder %v298_v19, 0.0  ;;  %v362_v27 = vmul.f32 0.01, %v298_v19  ;;  %vm331_vm13 = vcmp.gt.f32.partialorder %v299_v20, 0.0  ;;  %vm332_vm14 = vcmp.gt.f32.partialorder %v300_v21, 0.0 }
  0x26   : > { %424 = vst.msk [vmem:[%s749_s6 + $0x40] sm:$0xff] %vm415_vm0, %v391_v12  ;;  %v363_v28 = vmul.f32 0.01, %v299_v20  ;;  %v364_v29 = vmul.f32 0.01, %v300_v21  ;;  %vm333_vm15 = vcmp.gt.f32.partialorder %v301_v24, 0.0  ;;  %v302_v30 = vadd.f32 %v712_v1, %v266_v22 }
  0x27   : > { %425 = vst.msk [vmem:[%s749_s6 + $0x48] sm:$0xff] %vm415_vm0, %v392_v16  ;;  %v394_v31 = vsel %vm330_vm12, %v298_v19, %v362_v27  ;;  %v365_v32 = vmul.f32 0.01, %v301_v24  ;;  %v303_v33 = vadd.f32 %v712_v1, %v267_v25  ;;  %v304_v34 = vadd.f32 %v712_v1, %v268_v26 }
  0x28   : > { %426 = vst.msk [vmem:[%s749_s6 + $0x50] sm:$0xff] %vm415_vm0, %v393_v23  ;;  %v395_v35 = vsel %vm331_vm13, %v299_v20, %v363_v28  ;;  %v396_v36 = vsel %vm332_vm14, %v300_v21, %v364_v29  ;;  %vm334_vm1 = vcmp.gt.f32.partialorder %v302_v30, 0.0  ;;  %v366_v37 = vmul.f32 0.01, %v302_v30 }
  0x29   : > { %427 = vst.msk [vmem:[%s749_s6 + $0x58] sm:$0xff] %vm415_vm0, %v394_v31  ;;  %v397_v38 = vsel %vm333_vm15, %v301_v24, %v365_v32  ;;  %vm335_vm2 = vcmp.gt.f32.partialorder %v303_v33, 0.0  ;;  %v367_v39 = vmul.f32 0.01, %v303_v33  ;;  %vm336_vm3 = vcmp.gt.f32.partialorder %v304_v34, 0.0 }
  0x2a   : > { %428 = vst.msk [vmem:[%s749_s6 + $0x60] sm:$0xff] %vm415_vm0, %v395_v35  ;;  %v398_v40 = vsel %vm334_vm1, %v302_v30, %v366_v37  ;;  %v368_v41 = vmul.f32 0.01, %v304_v34  ;;  %v269_v42 = vmul.f32 %v699_v0, %v759_v43  ;;  %v270_v52 = vmul.f32 %v699_v0, %v762_v44 }
  0x2b   : > { %429 = vst.msk [vmem:[%s749_s6 + $0x68] sm:$0xff] %vm415_vm0, %v396_v36  ;;  %v399_v53 = vsel %vm335_vm2, %v303_v33, %v367_v39  ;;  %v271_v54 = vmul.f32 %v699_v0, %v765_v45  ;;  %v272_v58 = vmul.f32 %v699_v0, %v768_v46  ;;  %v273_v59 = vmul.f32 %v699_v0, %v771_v47 }
  0x2c   : > { %430 = vst.msk [vmem:[%s749_s6 + $0x70] sm:$0xff] %vm415_vm0, %v397_v38  ;;  %v400_v43 = vsel %vm336_vm3, %v304_v34, %v368_v41  ;;  %v305_v60 = vadd.f32 %v712_v1, %v269_v42  ;;  %v306_v44 = vadd.f32 %v712_v1, %v270_v52  ;;  %v274_v63 = vmul.f32 %v699_v0, %v774_v48 }
  0x2d   : > { %431 = vst.msk [vmem:[%s749_s6 + $0x78] sm:$0xff] %vm415_vm0, %v398_v40  ;;  %v307_v45 = vadd.f32 %v712_v1, %v271_v54  ;;  %v308_v46 = vadd.f32 %v712_v1, %v272_v58  ;;  %v309_v2 = vadd.f32 %v712_v1, %v273_v59  ;;  %v275_v47 = vmul.f32 %v699_v0, %v777_v49 }
  0x2e   : > { %432 = vst.msk [vmem:[%s749_s6 + $0x80] sm:$0xff] %vm415_vm0, %v399_v53  ;;  %vm337_vm4 = vcmp.gt.f32.partialorder %v305_v60, 0.0  ;;  %v369_v3 = vmul.f32 0.01, %v305_v60  ;;  %vm338_vm5 = vcmp.gt.f32.partialorder %v306_v44, 0.0  ;;  %v310_v48 = vadd.f32 %v712_v1, %v274_v63 }
  0x2f   : > { %433 = vst.msk [vmem:[%s749_s6 + $0x88] sm:$0xff] %vm415_vm0, %v400_v43  ;;  %v370_v4 = vmul.f32 0.01, %v306_v44  ;;  %vm339_vm6 = vcmp.gt.f32.partialorder %v307_v45, 0.0  ;;  %v371_v5 = vmul.f32 0.01, %v307_v45  ;;  %v311_v6 = vadd.f32 %v712_v1, %v275_v47 }
  0x30   : > { %v401_v7 = vsel %vm337_vm4, %v305_v60, %v369_v3  ;;  %vm340_vm7 = vcmp.gt.f32.partialorder %v308_v46, 0.0  ;;  %v372_v8 = vmul.f32 0.01, %v308_v46  ;;  %vm341_vm8 = vcmp.gt.f32.partialorder %v309_v2, 0.0 }
  0x31   : > { %434 = vst.msk [vmem:[%s749_s6 + $0x90] sm:$0xff] %vm415_vm0, %v401_v7  ;;  %v402_v49 = vsel %vm338_vm5, %v306_v44, %v370_v4  ;;  %v403_v9 = vsel %vm339_vm6, %v307_v45, %v371_v5  ;;  %v373_v10 = vmul.f32 0.01, %v309_v2  ;;  %vm342_vm9 = vcmp.gt.f32.partialorder %v310_v48, 0.0 }
  0x32   : > { %435 = vst.msk [vmem:[%s749_s6 + $0x98] sm:$0xff] %vm415_vm0, %v402_v49  ;;  %v404_v11 = vsel %vm340_vm7, %v308_v46, %v372_v8  ;;  %v374_v12 = vmul.f32 0.01, %v310_v48  ;;  %vm343_vm10 = vcmp.gt.f32.partialorder %v311_v6, 0.0  ;;  %v375_v13 = vmul.f32 0.01, %v311_v6 }
  0x33   : > { %436 = vst.msk [vmem:[%s749_s6 + $0xa0] sm:$0xff] %vm415_vm0, %v403_v9  ;;  %v405_v14 = vsel %vm341_vm8, %v309_v2, %v373_v10  ;;  %v276_v15 = vmul.f32 %v699_v0, %v780_v50  ;;  %v277_v16 = vmul.f32 %v699_v0, %v783_v51  ;;  %v278_v17 = vmul.f32 %v699_v0, %v788_v55 }
  0x34   : > { %437 = vst.msk [vmem:[%s749_s6 + $0xa8] sm:$0xff] %vm415_vm0, %v404_v11  ;;  %v406_v18 = vsel %vm342_vm9, %v310_v48, %v374_v12  ;;  %v407_v19 = vsel %vm343_vm10, %v311_v6, %v375_v13  ;;  %v279_v20 = vmul.f32 %v699_v0, %v791_v56  ;;  %v280_v21 = vmul.f32 %v699_v0, %v794_v57 }
  0x35   : > { %438 = vst.msk [vmem:[%s749_s6 + $0xb0] sm:$0xff] %vm415_vm0, %v405_v14  ;;  %v312_v50 = vadd.f32 %v712_v1, %v276_v15  ;;  %v313_v51 = vadd.f32 %v712_v1, %v277_v16  ;;  %v314_v22 = vadd.f32 %v712_v1, %v278_v17  ;;  %v281_v55 = vmul.f32 %v699_v0, %v799_v61 }
  0x36   : > { %439 = vst.msk [vmem:[%s749_s6 + $0xb8] sm:$0xff] %vm415_vm0, %v406_v18  ;;  %v315_v23 = vadd.f32 %v712_v1, %v279_v20  ;;  %v316_v56 = vadd.f32 %v712_v1, %v280_v21  ;;  %v282_v57 = vmul.f32 %v699_v0, %v802_v62 }
  0x37   : > { %440 = vst.msk [vmem:[%s749_s6 + $0xc0] sm:$0xff] %vm415_vm0, %v407_v19  ;;  %vm344_vm11 = vcmp.gt.f32.partialorder %v312_v50, 0.0  ;;  %v376_v24 = vmul.f32 0.01, %v312_v50  ;;  %vm345_vm12 = vcmp.gt.f32.partialorder %v313_v51, 0.0  ;;  %vm346_vm13 = vcmp.gt.f32.partialorder %v314_v22, 0.0 }
  0x38   : > { %v377_v25 = vmul.f32 0.01, %v313_v51  ;;  %v378_v26 = vmul.f32 0.01, %v314_v22  ;;  %vm347_vm14 = vcmp.gt.f32.partialorder %v315_v23, 0.0  ;;  %vm348_vm15 = vcmp.gt.f32.partialorder %v316_v56, 0.0 }
  0x39   : > { %v408_v61 = vsel %vm344_vm11, %v312_v50, %v376_v24  ;;  %v379_v27 = vmul.f32 0.01, %v315_v23  ;;  %v380_v28 = vmul.f32 0.01, %v316_v56  ;;  %v317_v29 = vadd.f32 %v712_v1, %v281_v55 }
  0x3a   : > { %441 = vst.msk [vmem:[%s749_s6 + $0xc8] sm:$0xff] %vm415_vm0, %v408_v61  ;;  %v409_v0 = vsel %vm345_vm12, %v313_v51, %v377_v25  ;;  %v410_v62 = vsel %vm346_vm13, %v314_v22, %v378_v26  ;;  %v318_v30 = vadd.f32 %v712_v1, %v282_v57 }
  0x3b   : > { %442 = vst.msk [vmem:[%s749_s6 + $0xd0] sm:$0xff] %vm415_vm0, %v409_v0  ;;  %v411_v31 = vsel %vm347_vm14, %v315_v23, %v379_v27  ;;  %v412_v32 = vsel %vm348_vm15, %v316_v56, %v380_v28  ;;  %vm349_vm1 = vcmp.gt.f32.partialorder %v317_v29, 0.0  ;;  %v381_v33 = vmul.f32 0.01, %v317_v29 }
  0x3c   : > { %443 = vst.msk [vmem:[%s749_s6 + $0xd8] sm:$0xff] %vm415_vm0, %v410_v62  ;;  %vm350_vm2 = vcmp.gt.f32.partialorder %v318_v30, 0.0  ;;  %v382_v34 = vmul.f32 0.01, %v318_v30 }
  0x3d   : > { %444 = vst.msk [vmem:[%s749_s6 + $0xe0] sm:$0xff] %vm415_vm0, %v411_v31  ;;  %v413_v35 = vsel %vm349_vm1, %v317_v29, %v381_v33 }
  0x3e   : > { %445 = vst.msk [vmem:[%s749_s6 + $0xe8] sm:$0xff] %vm415_vm0, %v412_v32  ;;  %v414_v36 = vsel %vm350_vm2, %v318_v30, %v382_v34 }
  0x3f   : > { %446 = vst.msk [vmem:[%s749_s6 + $0xf0] sm:$0xff] %vm415_vm0, %v413_v35 }
  0x40   : > { %447 = vst.msk [vmem:[%s749_s6 + $0xf8] sm:$0xff] %vm415_vm0, %v414_v36 }
  0x41 PF: > { %s13_s16 = sadd.s32 1, %s642_s16   ;;  %s944_s12 = smov %s634_s14 }
  0x42   : > { %p10_p7 = scmp.ge.s32.totalorder %s13_s16, 6   ;;  %s945_s13 = smov %s638_s15 }
  0x43   : > { %s946_s14 = smov %s949_s17  ;;  %s947_s15 = smov %s953_s18 }
  0x44   :  { %12 = sbr.rel (!%p10_p7) target bundleno = 3 (0x3), region = 62 }

// kernel: upconv_forward.2
= control target key start
LH: loop header
LB: loop body
LE: loop exit
PB: predicated region body
PF: predicated region fallthrough
CT: control target
= control target key end

     0   :  { %s1317_s12 = smov 0   ;;  %s1319_s13 = smov 0   ;;  %s1710_s0 = inlined_call_operand.vmem [shape: f32[2,18,16,12], index: 0, kind: input, shape index: {}]   ;;  %s1711_s1 = inlined_call_operand.vmem [shape: f32[2,2,12,16], index: 1, kind: input, shape index: {}]   ;;  %s1712_s2 = inlined_call_operand.vmem [shape: f32[2,16,2,16,16], index: 2, kind: output, shape index: {0}]   ;;  %s1713_s3 = inlined_call_operand.vmem [shape: f32[2,2,2,16], index: 3, kind: output, shape index: {1}]  }
   0x1   :  { %s1321_s14 = smov 0   ;;  %s1323_s15 = smov 0  }
   0x2   :  { %s1325_s16 = smov 0  }
   0x3 LB: > { %s23_s17 = sadd.s32 1, %s1287_s14  ;;  %s26_s18 = sadd.s32 1, %s1291_s15  ;;  %s1295_s16 = sphi %s1325_s16, %s14_s16   ;;  %s1291_s15 = sphi %s1323_s15, %s1717_s15   ;;  %s1287_s14 = sphi %s1321_s14, %s1716_s14   ;;  %s1283_s13 = sphi %s1319_s13, %s1715_s13   ;;  %s1279_s12 = sphi %s1317_s12, %s1714_s12  }
   0x4   : > { %p24_p0 = scmp.ge.s32.totalorder %s23_s17, 2  ;;  %p1075_p1 = scmp.ge.s32.totalorder %s1295_s16, 1 }
   0x5   : > { %p156_p2 = scmp.lt.s32.totalorder %s1295_s16, 5 }
   0x6   : > { %s1719_s17 = smov (%p24_p0, %s23_s17), 0  ;;  %s1721_s18 = smov (!%p24_p0, %s26_s18), %s1291_s15 }
   0x7   : > { %p157_p3 = pnand %p1075_p1, %p156_p2  ;;  %p28_p4 = scmp.ge.s32.totalorder %s1721_s18, 2 }
   0x8   : > { %p193_p5 = scmp.lt.s32.totalorder (!%p157_p3), %s1283_s13, 1  ;;  %s1213_s9 = sshll.u32 (!%p157_p3), %s1279_s12, 7 }
   0x9   : > { %s1723_s18 = smov (%p28_p4, %s1721_s18), 0  ;;  %160 = sbr.rel (%p157_p3) target bundleno = 296 (0x128), region = 28 }
   0xa   : > { %s1077_s21 = sshll.u32 (!%p157_p3), %s1279_s12, 3  ;;  %p211_p7 = scmp.lt.s32.totalorder (!%p157_p3), %s1279_s12, 1 }
   0xb   : > { %p201_p6 = scmp.lt.s32.totalorder (!%p157_p3), %s1077_s21, 15 }
   0xe   : > { %v1122_v0 = vld [vmem:[%s1711_s1 + $0x18] sm:$0xf]  ;;  %vm328_vm0 = vcmask 1043456   ;;  %v275_v1 = vld [vmem:[%s1711_s1 + $0x8] sm:$0xf]  ;;  %v1121_v2 = vld [vmem:[%s1711_s1 + $0x10] sm:$0xff] }
   0xf   : > { %1123 = vmatpush.msk.msra.mxu0 %vm328_vm0, %v1122_v0  ;;  %1140 = vmatpush.msk.msra.mxu1 %vm328_vm0, %v275_v1  ;;  %v1160_v3 = vld [vmem:[%s1711_s1 + $0x38] sm:$0xf]  ;;  %v1158_v4 = vld [vmem:[%s1711_s1 + $0x28] sm:$0xf]  ;;  %v274_v5 = vld [vmem:[%s1711_s1] sm:$0xff]  ;;  %s1725_s13 = smov (!%p193_p5, %s1283_s13), 1 }
  0x10   : > { %1161 = vmatpush.msk.msra.mxu2 %vm328_vm0, %v1160_v3  ;;  %1178 = vmatpush.msk.msra.mxu3 %vm328_vm0, %v1158_v4  ;;  %v1159_v6 = vld [vmem:[%s1711_s1 + $0x30] sm:$0xff]  ;;  %v1157_v7 = vld [vmem:[%s1711_s1 + $0x20] sm:$0xff]  ;;  %s1216_s8 = smul.u32 288, %s1725_s13  ;;  %vm279_vm1 = vcmask 97280   ;;  %s1727_s21 = smov (!%p201_p6, %s1077_s21), 15  ;;  %vm513_vm2 = vcmask 130048  }
  0x11   : > { %347 = vmatpush.msra.mxu0 %v1121_v2  ;;  %463 = vmatpush.msra.mxu1 %v274_v5  ;;  %s1078_s22 = sshll.u32 %s1727_s21, 2  ;;  %s1079_s23 = sshll.u32 %s1725_s13, 6  ;;  %vm921_vm3 = vcmask 122880  }
  0x12   : > { %694 = vmatpush.msra.mxu2 %v1159_v6  ;;  %762 = vmatpush.msra.mxu3 %v1157_v7  ;;  %s197_s19 = scalar_lea.vmem %s1710_s0, %s1216_s8  ;;  %s205_s24 = sadd.s32 %s1079_s23, %s1078_s22 }
  0x13   : > { %s1384_s20 = scalar_lea.vmem %s197_s19, %s1213_s9  ;;  %s1080_s25 = sshll.u32 %s205_s24, 3 }
  0x14   : > { %v1087_v8 = vld [vmem:[%s1384_s20 + $0x10] sm:$0xff]  ;;  %v220_v9 = vld [vmem:[%s1384_s20] sm:$0xff]  ;;  %v1088_v11 = vld [vmem:[%s1384_s20 + $0x18] sm:$0xff]  ;;  %s1475_s28 = scalar_lea.vmem %s1712_s2, %s1080_s25  ;;  %s1729_s12 = smov (!%p211_p7, %s1279_s12), 1 }
  0x15   : > { %v1105_v10 = vld [vmem:[%s1384_s20 + $0x20] sm:$0xff]  ;;  %1124 = vmatmul.msk.f32.vlgmr.msra.gmra.mxu0 %vm279_vm1, %v1087_v8  ;;  %1141 = vmatmul.msk.f32.vlgmr.msra.gmra.mxu1 %vm279_vm1, %v220_v9  ;;  %v221_v12 = vld [vmem:[%s1384_s20 + $0x8] sm:$0xff]  ;;  %v1107_v14 = vld [vmem:[%s1384_s20 + $0x30] sm:$0xff]  ;;  %s1081_s29 = sshll.u32 %s1725_s13, 1 }
  0x16   : > { %1162 = vmatmul.msk.f32.vlgmr.msra.gmra.mxu2 %vm279_vm1, %v1105_v10  ;;  %1179 = vmatmul.msk.f32.vlgmr.msra.gmra.mxu3 %vm279_vm1, %v1087_v8  ;;  %v1106_v13 = vld [vmem:[%s1384_s20 + $0x28] sm:$0xff]  ;;  %v1108_v15 = vld [vmem:[%s1384_s20 + $0x38] sm:$0xff]  ;;  %v1109_v16 = vld [vmem:[%s1384_s20 + $0x40] sm:$0xff]  ;;  %s214_s30 = sadd.s32 %s1081_s29, %s1729_s12 }
  0x17   : > { %v1110_v17 = vld [vmem:[%s1384_s20 + $0x48] sm:$0xff]  ;;  %v1111_v18 = vld [vmem:[%s1384_s20 + $0x50] sm:$0xff]  ;;  %v1112_v19 = vld [vmem:[%s1384_s20 + $0x58] sm:$0xff]  ;;  %s1082_s4 = sshll.u32 %s214_s30, 1 }
  0x18   : > { %v1113_v20 = vld [vmem:[%s1384_s20 + $0x60] sm:$0xff]  ;;  %v1114_v21 = vld [vmem:[%s1384_s20 + $0x68] sm:$0xff]  ;;  %v1115_v22 = vld [vmem:[%s1384_s20 + $0x70] sm:$0xff]  ;;  %s216_s13 = scalar_lea.vmem %s1713_s3, %s1082_s4 }
  0x19   : > { %v1116_v23 = vld [vmem:[%s1384_s20 + $0x78] sm:$0xff]  ;;  %v1117_v24 = vld [vmem:[%s1384_s20 + $0x80] sm:$0xff]  ;;  %v1118_v25 = vld [vmem:[%s1384_s20 + $0x88] sm:$0xff] }
  0x1a   : > { %v1119_v26 = vld [vmem:[%s1384_s20 + $0x90] sm:$0xff]  ;;  %v1120_v27 = vld [vmem:[%s1384_s20 + $0x98] sm:$0xff] }
  0x1d   : > { %1125 = vmatmul.msk.f32.gmra.mxu0 %vm279_vm1, %v1088_v11  ;;  %1142 = vmatmul.msk.f32.gmra.mxu1 %vm279_vm1, %v221_v12 }
  0x1e   : > { %1163 = vmatmul.msk.f32.gmra.mxu2 %vm279_vm1, %v1106_v13  ;;  %1180 = vmatmul.msk.f32.gmra.mxu3 %vm279_vm1, %v1088_v11 }
  0x25   : > { %1126 = vmatmul.msk.f32.gmra.mxu0 %vm279_vm1, %v1105_v10  ;;  %1143 = vmatmul.msk.f32.gmra.mxu1 %vm279_vm1, %v1087_v8 }
  0x26   : > { %1164 = vmatmul.msk.f32.gmra.mxu2 %vm279_vm1, %v1107_v14  ;;  %1181 = vmatmul.msk.f32.gmra.mxu3 %vm279_vm1, %v1105_v10 }
  0x2d   : > { %1127 = vmatmul.msk.f32.gmra.mxu0 %vm279_vm1, %v1106_v13  ;;  %1144 = vmatmul.msk.f32.gmra.mxu1 %vm279_vm1, %v1088_v11 }
  0x2e   : > { %1165 = vmatmul.msk.f32.gmra.mxu2 %vm279_vm1, %v1108_v15  ;;  %1182 = vmatmul.msk.f32.gmra.mxu3 %vm279_vm1, %v1106_v13 }
  0x35   : > { %1128 = vmatmul.msk.f32.gmra.mxu0 %vm279_vm1, %v1107_v14  ;;  %1145 = vmatmul.msk.f32.gmra.mxu1 %vm279_vm1, %v1105_v10 }
  0x36   : > { %1166 = vmatmul.msk.f32.gmra.mxu2 %vm279_vm1, %v1109_v16  ;;  %1183 = vmatmul.msk.f32.gmra.mxu3 %vm279_vm1, %v1107_v14 }
  0x3d   : > { %1129 = vmatmul.msk.f32.gmra.mxu0 %vm279_vm1, %v1108_v15  ;;  %1146 = vmatmul.msk.f32.gmra.mxu1 %vm279_vm1, %v1106_v13 }
  0x3e   : > { %1167 = vmatmul.msk.f32.gmra.mxu2 %vm279_vm1, %v1110_v17  ;;  %1184 = vmatmul.msk.f32.gmra.mxu3 %vm279_vm1, %v1108_v15 }
  0x45   : > { %1130 = vmatmul.msk.f32.gmra.mxu0 %vm279_vm1, %v1109_v16  ;;  %1147 = vmatmul.msk.f32.gmra.mxu1 %vm279_vm1, %v1107_v14 }
  0x46   : > { %1168 = vmatmul.msk.f32.gmra.mxu2 %vm279_vm1, %v1111_v18  ;;  %1185 = vmatmul.msk.f32.gmra.mxu3 %vm279_vm1, %v1109_v16 }
  0x4d   : > { %1131 = vmatmul.msk.f32.gmra.mxu0 %vm279_vm1, %v1110_v17  ;;  %1148 = vmatmul.msk.f32.gmra.mxu1 %vm279_vm1, %v1108_v15 }
  0x4e   : > { %1169 = vmatmul.msk.f32.gmra.mxu2 %vm279_vm1, %v1112_v19  ;;  %1186 = vmatmul.msk.f32.gmra.mxu3 %vm279_vm1, %v1110_v17 }
  0x55   : > { %1132 = vmatmul.msk.f32.gmra.mxu0 %vm279_vm1, %v1111_v18  ;;  %1149 = vmatmul.msk.f32.gmra.mxu1 %vm279_vm1, %v1109_v16 }
  0x56   : > { %1170 = vmatmul.msk.f32.gmra.mxu2 %vm279_vm1, %v1113_v20  ;;  %1187 = vmatmul.msk.f32.gmra.mxu3 %vm279_vm1, %v1111_v18 }
  0x5d   : > { %1133 = vmatmul.msk.f32.gmra.mxu0 %vm279_vm1, %v1112_v19  ;;  %1150 = vmatmul.msk.f32.gmra.mxu1 %vm279_vm1, %v1110_v17 }
  0x5e   : > { %1171 = vmatmul.msk.f32.gmra.mxu2 %vm279_vm1, %v1114_v21  ;;  %1188 = vmatmul.msk.f32.gmra.mxu3 %vm279_vm1, %v1112_v19 }
  0x65   : > { %1134 = vmatmul.msk.f32.gmra.mxu0 %vm279_vm1, %v1113_v20  ;;  %1151 = vmatmul.msk.f32.gmra.mxu1 %vm279_vm1, %v1111_v18 }
  0x66   : > { %1172 = vmatmul.msk.f32.gmra.mxu2 %vm279_vm1, %v1115_v22  ;;  %1189 = vmatmul.msk.f32.gmra.mxu3 %vm279_vm1, %v1113_v20 }
  0x6d   : > { %1135 = vmatmul.msk.f32.gmra.mxu0 %vm279_vm1, %v1114_v21  ;;  %1152 = vmatmul.msk.f32.gmra.mxu1 %vm279_vm1, %v1112_v19 }
  0x6e   : > { %1173 = vmatmul.msk.f32.gmra.mxu2 %vm279_vm1, %v1116_v23  ;;  %1190 = vmatmul.msk.f32.gmra.mxu3 %vm279_vm1, %v1114_v21 }
  0x75   : > { %1136 = vmatmul.msk.f32.gmra.mxu0 %vm279_vm1, %v1115_v22  ;;  %1153 = vmatmul.msk.f32.gmra.mxu1 %vm279_vm1, %v1113_v20 }
  0x76   : > { %1174 = vmatmul.msk.f32.gmra.mxu2 %vm279_vm1, %v1117_v24  ;;  %1191 = vmatmul.msk.f32.gmra.mxu3 %vm279_vm1, %v1115_v22 }
  0x7d   : > { %1137 = vmatmul.msk.f32.gmra.mxu0 %vm279_vm1, %v1116_v23  ;;  %1154 = vmatmul.msk.f32.gmra.mxu1 %vm279_vm1, %v1114_v21 }
  0x7e   : > { %1175 = vmatmul.msk.f32.gmra.mxu2 %vm279_vm1, %v1118_v25  ;;  %1192 = vmatmul.msk.f32.gmra.mxu3 %vm279_vm1, %v1116_v23 }
  0x85   : > { %1138 = vmatmul.msk.f32.gmra.mxu0 %vm279_vm1, %v1117_v24  ;;  %1155 = vmatmul.msk.f32.gmra.mxu1 %vm279_vm1, %v1115_v22 }
  0x86   : > { %1176 = vmatmul.msk.f32.gmra.mxu2 %vm279_vm1, %v1119_v26  ;;  %1193 = vmatmul.msk.f32.gmra.mxu3 %vm279_vm1, %v1117_v24 }
  0x8d   : > { %1139 = vmatmul.msk.f32.gmra.mxu0 %vm279_vm1, %v1118_v25  ;;  %1156 = vmatmul.msk.f32.gmra.mxu1 %vm279_vm1, %v1116_v23 }
  0x8e   : > { %1177 = vmatmul.msk.f32.gmra.mxu2 %vm279_vm1, %v1120_v27  ;;  %1194 = vmatmul.msk.f32.gmra.mxu3 %vm279_vm1, %v1118_v25 }
  0x92   : > { %v349_v28 = vpop.f32.mrf.mxu0  ;;  %v465_v29 = vpop.f32.mrf.mxu1 }
  0x93   : > { %v466_v30 = vadd.f32 %v465_v29, %v349_v28 }
  0x95   : > { %514 = vst.msk [vmem:[%s1475_s28] sm:$0xff] %vm513_vm2, %v466_v30  ;;  %v568_v36 = vmul.f32 %v466_v30, %v466_v30  ;;  %v530_v38 = vsel %vm513_vm2, %v466_v30, 0.0 }
  0x97   : > { %v584_v42 = vsel %vm513_vm2, %v568_v36, 0.0 }
  0x99   : > { %v696_v31 = vpop.f32.mrf.mxu2  ;;  %v764_v32 = vpop.f32.mrf.mxu3 }
  0x9a   : > { %v765_v33 = vadd.f32 %v764_v32, %v696_v31  ;;  %v352_v34 = vpop.f32.mrf.mxu0  ;;  %v468_v35 = vpop.f32.mrf.mxu1 }
  0x9b   : > { %v469_v37 = vadd.f32 %v468_v35, %v352_v34 }
  0x9c   : > { %1195 = vst.msk [vmem:[%s1475_s28 + $0x10] sm:$0xff] %vm513_vm2, %v765_v33  ;;  %v867_v47 = vmul.f32 %v765_v33, %v765_v33  ;;  %v829_v52 = vsel %vm513_vm2, %v765_v33, 0.0 }
  0x9d   : > { %515 = vst.msk [vmem:[%s1475_s28 + $0x8] sm:$0xff] %vm513_vm2, %v469_v37  ;;  %v531_v39 = vsel %vm513_vm2, %v469_v37, 0.0  ;;  %v569_v40 = vmul.f32 %v469_v37, %v469_v37 }
  0x9e   : > { %v532_v41 = vadd.f32 %v531_v39, %v530_v38  ;;  %v883_v58 = vsel %vm513_vm2, %v867_v47, 0.0 }
  0x9f   : > { %v585_v43 = vsel %vm513_vm2, %v569_v40, 0.0 }
  0xa0   : > { %v586_v44 = vadd.f32 %v585_v43, %v584_v42 }
  0xa1   : > { %v699_v45 = vpop.f32.mrf.mxu2  ;;  %v767_v46 = vpop.f32.mrf.mxu3 }
  0xa2   : > { %v768_v48 = vadd.f32 %v767_v46, %v699_v45  ;;  %v355_v49 = vpop.f32.mrf.mxu0  ;;  %v471_v50 = vpop.f32.mrf.mxu1 }
  0xa3   : > { %v472_v51 = vadd.f32 %v471_v50, %v355_v49 }
  0xa4   : > { %1196 = vst.msk [vmem:[%s1475_s28 + $0x18] sm:$0xff] %vm513_vm2, %v768_v48  ;;  %v830_v53 = vsel %vm513_vm2, %v768_v48, 0.0  ;;  %v868_v54 = vmul.f32 %v768_v48, %v768_v48 }
  0xa5   : > { %v831_v55 = vadd.f32 %v830_v53, %v829_v52  ;;  %516 = vst.msk [vmem:[%s1475_s28 + $0x20] sm:$0xff] %vm513_vm2, %v472_v51  ;;  %v533_v56 = vsel %vm513_vm2, %v472_v51, 0.0  ;;  %v570_v57 = vmul.f32 %v472_v51, %v472_v51 }
  0xa6   : > { %v884_v59 = vsel %vm513_vm2, %v868_v54, 0.0  ;;  %v534_v60 = vadd.f32 %v533_v56, %v532_v41 }
  0xa7   : > { %v885_v61 = vadd.f32 %v884_v59, %v883_v58  ;;  %v587_v62 = vsel %vm513_vm2, %v570_v57, 0.0 }
  0xa8   : > { %v588_v63 = vadd.f32 %v587_v62, %v586_v44 }
  0xa9   : > { %v702_v0 = vpop.f32.mrf.mxu2  ;;  %v770_v1 = vpop.f32.mrf.mxu3 }
  0xaa   : > { %v771_v2 = vadd.f32 %v770_v1, %v702_v0  ;;  %v358_v3 = vpop.f32.mrf.mxu0  ;;  %v474_v4 = vpop.f32.mrf.mxu1 }
  0xab   : > { %v475_v5 = vadd.f32 %v474_v4, %v358_v3 }
  0xac   : > { %1197 = vst.msk [vmem:[%s1475_s28 + $0x30] sm:$0xff] %vm513_vm2, %v771_v2  ;;  %v832_v6 = vsel %vm513_vm2, %v771_v2, 0.0  ;;  %v869_v7 = vmul.f32 %v771_v2, %v771_v2 }
  0xad   : > { %v833_v8 = vadd.f32 %v832_v6, %v831_v55  ;;  %517 = vst.msk [vmem:[%s1475_s28 + $0x28] sm:$0xff] %vm513_vm2, %v475_v5  ;;  %v535_v9 = vsel %vm513_vm2, %v475_v5, 0.0  ;;  %v571_v10 = vmul.f32 %v475_v5, %v475_v5 }
  0xae   : > { %v886_v11 = vsel %vm513_vm2, %v869_v7, 0.0  ;;  %v536_v12 = vadd.f32 %v535_v9, %v534_v60 }
  0xaf   : > { %v887_v13 = vadd.f32 %v886_v11, %v885_v61  ;;  %v589_v14 = vsel %vm513_vm2, %v571_v10, 0.0 }
  0xb0   : > { %v590_v15 = vadd.f32 %v589_v14, %v588_v63 }
  0xb1   : > { %v705_v16 = vpop.f32.mrf.mxu2  ;;  %v773_v17 = vpop.f32.mrf.mxu3 }
  0xb2   : > { %v774_v18 = vadd.f32 %v773_v17, %v705_v16  ;;  %v361_v19 = vpop.f32.mrf.mxu0  ;;  %v477_v20 = vpop.f32.mrf.mxu1 }
  0xb3   : > { %v478_v21 = vadd.f32 %v477_v20, %v361_v19 }
  0xb4   : > { %1198 = vst.msk [vmem:[%s1475_s28 + $0x38] sm:$0xff] %vm513_vm2, %v774_v18  ;;  %v834_v22 = vsel %vm513_vm2, %v774_v18, 0.0  ;;  %v870_v23 = vmul.f32 %v774_v18, %v774_v18 }
  0xb5   : > { %v835_v24 = vadd.f32 %v834_v22, %v833_v8  ;;  %518 = vst.msk [vmem:[%s1475_s28 + $0x40] sm:$0xff] %vm513_vm2, %v478_v21  ;;  %v537_v25 = vsel %vm513_vm2, %v478_v21, 0.0  ;;  %v572_v26 = vmul.f32 %v478_v21, %v478_v21 }
  0xb6   : > { %v888_v27 = vsel %vm513_vm2, %v870_v23, 0.0  ;;  %v538_v28 = vadd.f32 %v537_v25, %v536_v12 }
  0xb7   : > { %v889_v29 = vadd.f32 %v888_v27, %v887_v13  ;;  %v591_v30 = vsel %vm513_vm2, %v572_v26, 0.0 }
  0xb8   : > { %v592_v31 = vadd.f32 %v591_v30, %v590_v15 }
  0xb9   : > { %v708_v32 = vpop.f32.mrf.mxu2  ;;  %v776_v33 = vpop.f32.mrf.mxu3 }
  0xba   : > { %v777_v34 = vadd.f32 %v776_v33, %v708_v32  ;;  %v364_v35 = vpop.f32.mrf.mxu0  ;;  %v480_v36 = vpop.f32.mrf.mxu1 }
  0xbb   : > { %v481_v37 = vadd.f32 %v480_v36, %v364_v35 }
  0xbc   : > { %1199 = vst.msk [vmem:[%s1475_s28 + $0x50] sm:$0xff] %vm513_vm2, %v777_v34  ;;  %v836_v38 = vsel %vm513_vm2, %v777_v34, 0.0  ;;  %v871_v39 = vmul.f32 %v777_v34, %v777_v34 }
  0xbd   : > { %v1516_v40 = vadd.f32 %v836_v38, %v835_v24  ;;  %519 = vst.msk [vmem:[%s1475_s28 + $0x48] sm:$0xff] %vm513_vm2, %v481_v37  ;;  %v539_v41 = vsel %vm513_vm2, %v481_v37, 0.0  ;;  %v573_v42 = vmul.f32 %v481_v37, %v481_v37 }
  0xbe   : > { %v890_v43 = vsel %vm513_vm2, %v871_v39, 0.0  ;;  %v1522_v44 = vadd.f32 %v539_v41, %v538_v28 }
  0xbf   : > { %v1524_v45 = vadd.f32 %v890_v43, %v889_v29  ;;  %v593_v46 = vsel %vm513_vm2, %v573_v42, 0.0 }
  0xc0   : > { %v1527_v47 = vadd.f32 %v593_v46, %v592_v31 }
  0xc1   : > { %v711_v48 = vpop.f32.mrf.mxu2  ;;  %v779_v49 = vpop.f32.mrf.mxu3 }
  0xc2   : > { %v780_v50 = vadd.f32 %v779_v49, %v711_v48  ;;  %v367_v51 = vpop.f32.mrf.mxu0  ;;  %v483_v52 = vpop.f32.mrf.mxu1 }
  0xc3   : > { %v484_v53 = vadd.f32 %v483_v52, %v367_v51 }
  0xc4   : > { %1200 = vst.msk [vmem:[%s1475_s28 + $0x58] sm:$0xff] %vm513_vm2, %v780_v50  ;;  %v872_v25 = vmul.f32 %v780_v50, %v780_v50  ;;  %v838_v28 = vsel %vm513_vm2, %v780_v50, 0.0 }
  0xc5   : > { %520 = vst.msk [vmem:[%s1475_s28 + $0x60] sm:$0xff] %vm513_vm2, %v484_v53  ;;  %v574_v27 = vmul.f32 %v484_v53, %v484_v53  ;;  %v541_v30 = vsel %vm513_vm2, %v484_v53, 0.0  ;;  %v839_v39 = vadd.f32 %v838_v28, %v1516_v40 }
  0xc6   : > { %v892_v29 = vsel %vm513_vm2, %v872_v25, 0.0  ;;  %v542_v42 = vadd.f32 %v541_v30, %v1522_v44 }
  0xc7   : > { %v595_v33 = vsel %vm513_vm2, %v574_v27, 0.0  ;;  %v893_v41 = vadd.f32 %v892_v29, %v1524_v45 }
  0xc8   : > { %v596_v53 = vadd.f32 %v595_v33, %v1527_v47 }
  0xc9   : > { %v714_v54 = vpop.f32.mrf.mxu2  ;;  %v782_v55 = vpop.f32.mrf.mxu3 }
  0xca   : > { %v783_v56 = vadd.f32 %v782_v55, %v714_v54  ;;  %v370_v57 = vpop.f32.mrf.mxu0  ;;  %v486_v58 = vpop.f32.mrf.mxu1 }
  0xcb   : > { %v1533_v59 = vadd.f32 %v486_v58, %v370_v57 }
  0xcc   : > { %1201 = vst.msk [vmem:[%s1475_s28 + $0x70] sm:$0xff] %vm513_vm2, %v783_v56  ;;  %v873_v31 = vmul.f32 %v783_v56, %v783_v56  ;;  %v840_v34 = vsel %vm513_vm2, %v783_v56, 0.0 }
  0xcd   : > { %521 = vst.msk [vmem:[%s1475_s28 + $0x68] sm:$0xff] %vm513_vm2, %v1533_v59  ;;  %v575_v32 = vmul.f32 %v1533_v59, %v1533_v59  ;;  %v543_v50 = vsel %vm513_vm2, %v1533_v59, 0.0  ;;  %v841_v40 = vadd.f32 %v840_v34, %v839_v39 }
  0xce   : > { %v894_v49 = vsel %vm513_vm2, %v873_v31, 0.0  ;;  %v544_v58 = vadd.f32 %v543_v50, %v542_v42 }
  0xcf   : > { %v597_v51 = vsel %vm513_vm2, %v575_v32, 0.0  ;;  %v895_v57 = vadd.f32 %v894_v49, %v893_v41 }
  0xd0   : > { %v598_v59 = vadd.f32 %v597_v51, %v596_v53 }
  0xd1   : > { %v717_v60 = vpop.f32.mrf.mxu2  ;;  %v785_v61 = vpop.f32.mrf.mxu3 }
  0xd2   : > { %v1540_v62 = vadd.f32 %v785_v61, %v717_v60  ;;  %v373_v63 = vpop.f32.mrf.mxu0  ;;  %v489_v0 = vpop.f32.mrf.mxu1 }
  0xd3   : > { %v1542_v1 = vadd.f32 %v489_v0, %v373_v63 }
  0xd4   : > { %1202 = vst.msk [vmem:[%s1475_s28 + $0x78] sm:$0xff] %vm513_vm2, %v1540_v62  ;;  %v874_v35 = vmul.f32 %v1540_v62, %v1540_v62  ;;  %v842_v45 = vsel %vm513_vm2, %v1540_v62, 0.0 }
  0xd5   : > { %522 = vst.msk [vmem:[%s1475_s28 + $0x80] sm:$0xff] %vm513_vm2, %v1542_v1  ;;  %v576_v36 = vmul.f32 %v1542_v1, %v1542_v1  ;;  %v545_v55 = vsel %vm513_vm2, %v1542_v1, 0.0  ;;  %v843_v60 = vadd.f32 %v842_v45, %v841_v40 }
  0xd6   : > { %v896_v54 = vsel %vm513_vm2, %v874_v35, 0.0  ;;  %v546_v1 = vadd.f32 %v545_v55, %v544_v58 }
  0xd7   : > { %v599_v56 = vsel %vm513_vm2, %v576_v36, 0.0  ;;  %v897_v0 = vadd.f32 %v896_v54, %v895_v57 }
  0xd9   : > { %v720_v2 = vpop.f32.mrf.mxu2  ;;  %v788_v3 = vpop.f32.mrf.mxu3 }
  0xda   : > { %v1550_v4 = vadd.f32 %v788_v3, %v720_v2  ;;  %v376_v5 = vpop.f32.mrf.mxu0  ;;  %v492_v6 = vpop.f32.mrf.mxu1  ;;  %v600_v2 = vadd.f32 %v599_v56, %v598_v59 }
  0xdb   : > { %v1552_v7 = vadd.f32 %v492_v6, %v376_v5 }
  0xdc   : > { %1203 = vst.msk [vmem:[%s1475_s28 + $0x90] sm:$0xff] %vm513_vm2, %v1550_v4  ;;  %v875_v44 = vmul.f32 %v1550_v4, %v1550_v4  ;;  %v844_v61 = vsel %vm513_vm2, %v1550_v4, 0.0 }
  0xdd   : > { %523 = vst.msk [vmem:[%s1475_s28 + $0x88] sm:$0xff] %vm513_vm2, %v1552_v7  ;;  %v577_v47 = vmul.f32 %v1552_v7, %v1552_v7  ;;  %v547_v62 = vsel %vm513_vm2, %v1552_v7, 0.0 }
  0xde   : > { %v898_v3 = vsel %vm513_vm2, %v875_v44, 0.0 }
  0xdf   : > { %v601_v5 = vsel %vm513_vm2, %v577_v47, 0.0 }
  0xe0   : > { %v602_v25 = vadd.f32 %v601_v5, %v600_v2 }
  0xe1   : > { %v723_v8 = vpop.f32.mrf.mxu2  ;;  %v791_v9 = vpop.f32.mrf.mxu3 }
  0xe2   : > { %v1560_v10 = vadd.f32 %v791_v9, %v723_v8  ;;  %v379_v11 = vpop.f32.mrf.mxu0  ;;  %v495_v12 = vpop.f32.mrf.mxu1 }
  0xe3   : > { %v1562_v13 = vadd.f32 %v495_v12, %v379_v11  ;;  %v845_v11 = vadd.f32 %v844_v61, %v843_v60  ;;  %v548_v12 = vadd.f32 %v547_v62, %v546_v1 }
  0xe4   : > { %1204 = vst.msk [vmem:[%s1475_s28 + $0x98] sm:$0xff] %vm513_vm2, %v1560_v10  ;;  %v876_v6 = vmul.f32 %v1560_v10, %v1560_v10 }
  0xe5   : > { %524 = vst.msk [vmem:[%s1475_s28 + $0xa0] sm:$0xff] %vm513_vm2, %v1562_v13  ;;  %v578_v63 = vmul.f32 %v1562_v13, %v1562_v13  ;;  %v549_v8 = vsel %vm513_vm2, %v1562_v13, 0.0 }
  0xe6   : > { %v550_v27 = vadd.f32 %v549_v8, %v548_v12 }
  0xe9   : > { %v726_v14 = vpop.f32.mrf.mxu2  ;;  %v794_v15 = vpop.f32.mrf.mxu3 }
  0xea   : > { %v1570_v16 = vadd.f32 %v794_v15, %v726_v14  ;;  %v382_v17 = vpop.f32.mrf.mxu0  ;;  %v498_v18 = vpop.f32.mrf.mxu1  ;;  %v846_v14 = vsel %vm513_vm2, %v1560_v10, 0.0  ;;  %v900_v10 = vsel %vm513_vm2, %v876_v6, 0.0 }
  0xeb   : > { %v1572_v19 = vadd.f32 %v498_v18, %v382_v17  ;;  %v847_v31 = vadd.f32 %v846_v14, %v845_v11 }
  0xec   : > { %1205 = vst.msk [vmem:[%s1475_s28 + $0xb0] sm:$0xff] %vm513_vm2, %v1570_v16  ;;  %v877_v28 = vmul.f32 %v1570_v16, %v1570_v16  ;;  %v848_v33 = vsel %vm513_vm2, %v1570_v16, 0.0 }
  0xed   : > { %525 = vst.msk [vmem:[%s1475_s28 + $0xa8] sm:$0xff] %vm513_vm2, %v1572_v19  ;;  %v579_v4 = vmul.f32 %v1572_v19, %v1572_v19  ;;  %v551_v13 = vsel %vm513_vm2, %v1572_v19, 0.0 }
  0xee   : > { %v552_v34 = vadd.f32 %v551_v13, %v550_v27 }
  0xef   : > { %v605_v29 = vsel %vm513_vm2, %v579_v4, 0.0 }
  0xf1   : > { %v729_v20 = vpop.f32.mrf.mxu2  ;;  %v797_v21 = vpop.f32.mrf.mxu3 }
  0xf2   : > { %v1580_v22 = vadd.f32 %v797_v21, %v729_v20  ;;  %v385_v23 = vpop.f32.mrf.mxu0  ;;  %v501_v24 = vpop.f32.mrf.mxu1  ;;  %v603_v20 = vsel %vm513_vm2, %v578_v63, 0.0 }
  0xf3   : > { %v1582_v26 = vadd.f32 %v501_v24, %v385_v23  ;;  %v899_v24 = vadd.f32 %v898_v3, %v897_v0  ;;  %v604_v32 = vadd.f32 %v603_v20, %v602_v25 }
  0xf4   : > { %1206 = vst.msk [vmem:[%s1475_s28 + $0xb8] sm:$0xff] %vm513_vm2, %v1580_v22  ;;  %v878_v35 = vmul.f32 %v1580_v22, %v1580_v22 }
  0xf5   : > { %526 = vst.msk [vmem:[%s1475_s28 + $0xc0] sm:$0xff] %vm513_vm2, %v1582_v26  ;;  %v580_v21 = vmul.f32 %v1582_v26, %v1582_v26  ;;  %v553_v30 = vsel %vm513_vm2, %v1582_v26, 0.0  ;;  %v901_v39 = vadd.f32 %v900_v10, %v899_v24  ;;  %v902_v26 = vsel %vm513_vm2, %v877_v28, 0.0 }
  0xf6   : > { %v606_v41 = vadd.f32 %v605_v29, %v604_v32  ;;  %v554_v42 = vadd.f32 %v553_v30, %v552_v34  ;;  %v904_v56 = vsel %vm513_vm2, %v878_v35, 0.0 }
  0xf7   : > { %v607_v36 = vsel %vm513_vm2, %v580_v21, 0.0  ;;  %v903_v55 = vadd.f32 %v902_v26, %v901_v39 }
  0xf8   : > { %v608_v53 = vadd.f32 %v607_v36, %v606_v41 }
  0xf9   : > { %v732_v37 = vpop.f32.mrf.mxu2  ;;  %v800_v38 = vpop.f32.mrf.mxu3  ;;  %v905_v6 = vadd.f32 %v904_v56, %v903_v55 }
  0xfa   : > { %v1604_v43 = vadd.f32 %v800_v38, %v732_v37  ;;  %v388_v46 = vpop.f32.mrf.mxu0  ;;  %v504_v48 = vpop.f32.mrf.mxu1 }
  0xfb   : > { %v505_v52 = vadd.f32 %v504_v48, %v388_v46  ;;  %v849_v46 = vadd.f32 %v848_v33, %v847_v31 }
  0xfc   : > { %1207 = vst.msk [vmem:[%s1475_s28 + $0xd0] sm:$0xff] %vm513_vm2, %v1604_v43  ;;  %v879_v48 = vmul.f32 %v1604_v43, %v1604_v43  ;;  %v852_v58 = vsel %vm513_vm2, %v1604_v43, 0.0 }
  0xfd   : > { %527 = vst.msk [vmem:[%s1475_s28 + $0xc8] sm:$0xff] %vm513_vm2, %v505_v52  ;;  %v581_v19 = vmul.f32 %v505_v52, %v505_v52  ;;  %v555_v37 = vsel %vm513_vm2, %v505_v52, 0.0  ;;  %v850_v52 = vsel %vm513_vm2, %v1580_v22, 0.0 }
  0xfe   : > { %v556_v40 = vadd.f32 %v555_v37, %v554_v42  ;;  %v851_v22 = vadd.f32 %v850_v52, %v849_v46  ;;  %v906_v62 = vsel %vm513_vm2, %v879_v48, 0.0 }
  0xff   : > { %v609_v16 = vsel %vm513_vm2, %v581_v19, 0.0  ;;  %v907_v12 = vadd.f32 %v906_v62, %v905_v6 }
 0x100   : > { %v610_v59 = vadd.f32 %v609_v16, %v608_v53  ;;  %v853_v43 = vadd.f32 %v852_v58, %v851_v22 }
 0x101   : > { %v735_v7 = vpop.f32.mrf.mxu2  ;;  %v803_v9 = vpop.f32.mrf.mxu3 }
 0x102   : > { %v804_v15 = vadd.f32 %v803_v9, %v735_v7  ;;  %v391_v17 = vpop.f32.mrf.mxu0  ;;  %v507_v18 = vpop.f32.mrf.mxu1 }
 0x103   : > { %v508_v23 = vadd.f32 %v507_v18, %v391_v17 }
 0x104   : > { %1208 = vst.msk [vmem:[%s1475_s28 + $0xd8] sm:$0xff] %vm513_vm2, %v804_v15  ;;  %v880_v60 = vmul.f32 %v804_v15, %v804_v15  ;;  %v854_v1 = vsel %vm513_vm2, %v804_v15, 0.0 }
 0x105   : > { %528 = vst.msk [vmem:[%s1475_s28 + $0xe0] sm:$0xff] %vm513_vm2, %v508_v23  ;;  %v582_v38 = vmul.f32 %v508_v23, %v508_v23  ;;  %v557_v49 = vsel %vm513_vm2, %v508_v23, 0.0  ;;  %v855_v14 = vadd.f32 %v854_v1, %v853_v43 }
 0x106   : > { %v558_v61 = vadd.f32 %v557_v49, %v556_v40  ;;  %v908_v4 = vsel %vm513_vm2, %v880_v60, 0.0 }
 0x107   : > { %v611_v47 = vsel %vm513_vm2, %v582_v38, 0.0  ;;  %v909_v23 = vadd.f32 %v908_v4, %v907_v12 }
 0x108   : > { %v612_v2 = vadd.f32 %v611_v47, %v610_v59 }
 0x109   : > { %v738_v50 = vpop.f32.mrf.mxu2  ;;  %v806_v51 = vpop.f32.mrf.mxu3 }
 0x10a   : > { %v807_v45 = vadd.f32 %v806_v51, %v738_v50  ;;  %v394_v44 = vpop.f32.mrf.mxu0  ;;  %v510_v54 = vpop.f32.mrf.mxu1 }
 0x10b   : > { %v511_v57 = vadd.f32 %v510_v54, %v394_v44 }
 0x10c   : > { %1209 = vst.msk [vmem:[%s1475_s28 + $0xf0] sm:$0xff] %vm513_vm2, %v807_v45  ;;  %v881_v3 = vmul.f32 %v807_v45, %v807_v45  ;;  %v856_v7 = vsel %vm513_vm2, %v807_v45, 0.0 }
 0x10d   : > { %529 = vst.msk [vmem:[%s1475_s28 + $0xe8] sm:$0xff] %vm513_vm2, %v511_v57  ;;  %v559_v63 = vsel %vm513_vm2, %v511_v57, 0.0  ;;  %v583_v0 = vmul.f32 %v511_v57, %v511_v57  ;;  %v857_v24 = vadd.f32 %v856_v7, %v855_v14 }
 0x10e   : > { %v560_v5 = vadd.f32 %v559_v63, %v558_v61  ;;  %v910_v15 = vsel %vm513_vm2, %v881_v3, 0.0 }
 0x10f   : > { %v613_v8 = vsel %vm513_vm2, %v583_v0, 0.0  ;;  %v911_v10 = vadd.f32 %v910_v15, %v909_v23 }
 0x110   : > { %v561_v9 = vrot.slane %v560_v5, 4  ;;  %v614_v11 = vadd.f32 %v613_v8, %v612_v2 }
 0x111   : > { %v741_v17 = vpop.f32.mrf.mxu2  ;;  %v809_v18 = vpop.f32.mrf.mxu3 }
 0x112   : > { %v562_v20 = vadd.f32 %v561_v9, %v560_v5  ;;  %v615_v13 = vrot.slane %v614_v11, 4  ;;  %v810_v21 = vadd.f32 %v809_v18, %v741_v17 }
 0x114   : > { %v616_v25 = vadd.f32 %v615_v13, %v614_v11  ;;  %1210 = vst.msk [vmem:[%s1475_s28 + $0xf8] sm:$0xff] %vm513_vm2, %v810_v21  ;;  %v858_v27 = vsel %vm513_vm2, %v810_v21, 0.0  ;;  %v882_v28 = vmul.f32 %v810_v21, %v810_v21  ;;  %v563_v29 = vrot.slane %v562_v20, 2 }
 0x115   : > { %v859_v30 = vadd.f32 %v858_v27, %v857_v24 }
 0x116   : > { %v912_v19 = vsel %vm513_vm2, %v882_v28, 0.0  ;;  %v617_v31 = vrot.slane %v616_v25, 2  ;;  %v564_v34 = vadd.f32 %v563_v29, %v562_v20 }
 0x117   : > { %v860_v32 = vrot.slane %v859_v30, 4  ;;  %v913_v33 = vadd.f32 %v912_v19, %v911_v10 }
 0x118   : > { %v618_v37 = vadd.f32 %v617_v31, %v616_v25  ;;  %v565_v26 = vrot.slane %v564_v34, 1 }
 0x119   : > { %v861_v35 = vadd.f32 %v860_v32, %v859_v30  ;;  %v914_v36 = vrot.slane %v913_v33, 4 }
 0x11a   : > { %v619_v46 = vrot.slane %v618_v37, 1  ;;  %v566_v49 = vadd.f32 %v565_v26, %v564_v34 }
 0x11b   : > { %v862_v38 = vrot.slane %v861_v35, 2  ;;  %v915_v39 = vadd.f32 %v914_v36, %v913_v33 }
 0x11c   : > { %v620_v52 = vadd.f32 %v619_v46, %v618_v37 }
 0x11d   : > { %v863_v41 = vadd.f32 %v862_v38, %v861_v35  ;;  %v916_v42 = vrot.slane %v915_v39, 2 }
 0x11f   : > { %v864_v48 = vrot.slane %v863_v41, 1  ;;  %v917_v16 = vadd.f32 %v916_v42, %v915_v39 }
 0x121   : > { %v865_v50 = vadd.f32 %v864_v48, %v863_v41  ;;  %v918_v51 = vrot.slane %v917_v16, 1 }
 0x123   : > { %v866_v53 = vadd.f32 %v865_v50, %v566_v49  ;;  %v919_v40 = vadd.f32 %v918_v51, %v917_v16 }
 0x125   : > { %v920_v45 = vadd.f32 %v919_v40, %v620_v52  ;;  %922 = vst.msk [vmem:[%s216_s13] sm:$0x1] %vm921_vm3, %v866_v53 }
 0x127   : > { %923 = vst.msk [vmem:[%s216_s13 + $0x1] sm:$0x1] %vm921_vm3, %v920_v45 }
 0x128 PF: > { %s14_s16 = sadd.s32 1, %s1295_s16   ;;  %s1714_s12 = smov %s1287_s14 }
 0x129   : > { %p11_p8 = scmp.ge.s32.totalorder %s14_s16, 6   ;;  %s1715_s13 = smov %s1291_s15 }
 0x12a   : > { %s1716_s14 = smov %s1719_s17  ;;  %s1717_s15 = smov %s1723_s18 }
 0x12b   :  { %13 = sbr.rel (!%p11_p8) target bundleno = 3 (0x3), region = 77 }

</bundles_post_ra>
